<compile_context>
chip_gen: v7x
topology: tpu7x:2x2x1
jax: 0.10.0
libtpu: 0.0.40
codegen_flags: <defaults>
</compile_context>

<pallas_src>
import functools

import jax
import jax.numpy as jnp
from jax.experimental import pallas as pl
from jax.experimental.pallas import tpu as pltpu


# ------------------------------ small helpers ------------------------------


def _pick_batch_tile(batch, target=16):
    """Largest batch tile <= target that keeps BlockSpec dims legal."""
    if batch <= target:
        return batch
    for tb in range(target, 0, -1):
        if batch % tb == 0 and tb % 8 == 0:
            return tb
    return batch


def _layer_norm(y, gamma, beta, eps=1e-5):
    mean = jnp.mean(y, axis=-1, keepdims=True)
    var = jnp.mean((y - mean) ** 2, axis=-1, keepdims=True)
    return (y - mean) * jax.lax.rsqrt(var + eps) * gamma + beta


# --------------------- fused decoder stack (all layers) ---------------------


def _decoder_stack_kernel(
    h0_ref,       # (TB, S, E)   f32  embedded (shifted) configurations
    wqkv_ref,     # (1, E, 3E)   bf16 fused Q|K|V projection (this layer)
    bqkv_ref,     # (1, 1, 3E)   f32
    wo_ref,       # (1, E, E)    bf16 output projection (heads concatenated on rows)
    w1_ref,       # (1, E, FF)   bf16
    b1_ref,       # (1, 1, FF)   f32
    w2_ref,       # (1, FF, E)   bf16
    vecs_ref,     # (1, 6, E)    f32  rows: bo, ln1_g, ln1_b, b2, ln2_g, ln2_b
    o_ref,        # (TB, S, E)   f32
    h_scr,        # VMEM (TB*S, E) f32 activation carried across the depth axis
    *, heads_num,
):
    TB, S, E = h0_ref.shape
    H = heads_num
    Dh = E // H
    R = TB * S
    d = pl.program_id(1)

    @pl.when(d == 0)
    def _():
        h_scr[...] = h0_ref[...].reshape(R, E)

    h = h_scr[...]                                   # (R, E) f32
    hb = h.astype(jnp.bfloat16)

    vecs = vecs_ref[0]                               # (6, E)
    bo, ln1_g, ln1_b = vecs[0:1], vecs[1:2], vecs[2:3]
    b2, ln2_g, ln2_b = vecs[3:4], vecs[4:5], vecs[5:6]

    # ---- fused QKV projection: a single lane-dense MXU matmul ----
    qkv = jnp.dot(hb, wqkv_ref[0], preferred_element_type=jnp.float32) + bqkv_ref[0]
    q3 = qkv[:, 0:E].reshape(TB, S, E)
    k3 = qkv[:, E:2 * E].reshape(TB, S, E)
    v3 = qkv[:, 2 * E:3 * E].reshape(TB, S, E)

    rows = jax.lax.broadcasted_iota(jnp.int32, (S, S), 0)
    cols = jax.lax.broadcasted_iota(jnp.int32, (S, S), 1)
    causal = (rows >= cols)[None]                    # (1, S, S) autoregressive mask
    scale = 1.0 / (Dh ** 0.5)

    # ---- attention: small static per-head loop only for the softmax part ----
    heads_out = []
    for hd in range(H):
        sl = slice(hd * Dh, (hd + 1) * Dh)
        qh = q3[:, :, sl].astype(jnp.bfloat16)
        kh = k3[:, :, sl].astype(jnp.bfloat16)
        vh = v3[:, :, sl].astype(jnp.bfloat16)
        s = jnp.einsum("bqd,bkd->bqk", qh, kh,
                       preferred_element_type=jnp.float32) * scale
        s = jnp.where(causal, s, -1e30)
        s = s - jnp.max(s, axis=-1, keepdims=True)
        p = jnp.exp(s)
        p = p * pl.reciprocal(jnp.sum(p, axis=-1, keepdims=True), approx=True)
        heads_out.append(
            jnp.einsum("bqk,bkd->bqd", p.astype(jnp.bfloat16), vh,
                       preferred_element_type=jnp.float32))
    attn = jnp.concatenate(heads_out, axis=-1).reshape(R, E)       # (R, E) f32
    attn = jnp.dot(attn.astype(jnp.bfloat16), wo_ref[0],
                   preferred_element_type=jnp.float32) + bo

    y = _layer_norm(h + attn, ln1_g, ln1_b)

    # ---- feed forward ----
    ff = jnp.dot(y.astype(jnp.bfloat16), w1_ref[0],
                 preferred_element_type=jnp.float32) + b1_ref[0]
    ff = jnp.maximum(ff, 0.0)                                       # ReLU
    ff = jnp.dot(ff.astype(jnp.bfloat16), w2_ref[0],
                 preferred_element_type=jnp.float32) + b2

    out = _layer_norm(y + ff, ln2_g, ln2_b)
    h_scr[...] = out

    @pl.when(d == pl.num_programs(1) - 1)
    def _():
        o_ref[...] = out.reshape(TB, S, E)


def decoder_stack(h0, stack, *, heads_num, batch_tile=None):
    B, S, E = h0.shape
    D = stack["wqkv"].shape[0]
    FF = stack["w1"].shape[2]
    TB = batch_tile or _pick_batch_tile(B)
    kernel = functools.partial(_decoder_stack_kernel, heads_num=heads_num)
    wmap = lambda b, d: (d, 0, 0)

    return pl.pallas_call(
        kernel,
        out_shape=jax.ShapeDtypeStruct((B, S, E), jnp.float32),
        grid_spec=pltpu.PrefetchScalarGridSpec(
            num_scalar_prefetch=0,
            grid=(B // TB, D),
            in_specs=[
                pl.BlockSpec((TB, S, E), lambda b, d: (b, 0, 0)),
                pl.BlockSpec((1, E, 3 * E), wmap),   # wqkv
                pl.BlockSpec((1, 1, 3 * E), wmap),   # bqkv
                pl.BlockSpec((1, E, E), wmap),       # wo
                pl.BlockSpec((1, E, FF), wmap),      # ffn w1
                pl.BlockSpec((1, 1, FF), wmap),      # ffn b1
                pl.BlockSpec((1, FF, E), wmap),      # ffn w2
                pl.BlockSpec((1, 6, E), wmap),       # packed bo/ln1/b2/ln2 vectors
            ],
            out_specs=pl.BlockSpec((TB, S, E), lambda b, d: (b, 0, 0)),
            scratch_shapes=[pltpu.VMEM((TB * S, E), jnp.float32)],
        ),
        compiler_params=pltpu.CompilerParams(
            dimension_semantics=("parallel", "arbitrary"),
            vmem_limit_bytes=64 * 1024 * 1024,
        ),
    )(h0, stack["wqkv"], stack["bqkv"], stack["wo"],
      stack["w1"], stack["b1"], stack["w2"], stack["vecs"])


# --------------- tail MLP + normalize + gather + site product ---------------


def _tail_kernel(h_ref, x_ref, w1_ref, b1_ref, w2_ref, b2_ref, psi_ref):
    TB, S, E = h_ref.shape
    P = w2_ref.shape[1]

    h = h_ref[...].reshape(TB * S, E).astype(jnp.bfloat16)
    t = jnp.dot(h, w1_ref[...], preferred_element_type=jnp.float32) + b1_ref[...]
    t = t * jax.nn.sigmoid(t)                                        # SiLU (f32)
    psi = jnp.dot(t.astype(jnp.bfloat16), w2_ref[...],
                  preferred_element_type=jnp.float32) + b2_ref[...]  # (TB*S, P)

    # psi / sqrt(sum(psi * psi, -1))  (real tail: conj == identity)
    norm = jnp.sum(psi * psi, axis=-1, keepdims=True)
    psi = psi * jax.lax.rsqrt(norm + 1e-30)

    # gather psi at the sampled configuration via one-hot (no lane gather)
    psi3 = psi.reshape(TB, S, P)
    lanes = jax.lax.broadcasted_iota(jnp.int32, (TB, S, P), 2)
    onehot = (lanes == x_ref[...][:, :, None]).astype(jnp.float32)
    sel = jnp.sum(psi3 * onehot, axis=-1)                            # (TB, S)

    # product over sites: lane-halving tree (log2(S) full-width VPU multiplies)
    Spad = 1 << (S - 1).bit_length()
    if Spad != S:
        sel = jnp.concatenate(
            [sel, jnp.ones((TB, Spad - S), jnp.float32)], axis=-1)
    m = Spad
    while m > 1:
        m //= 2
        sel = sel[:, :m] * sel[:, m:2 * m]
    psi_ref[...] = sel                                               # (TB, 1)


def tail_psi(h, x_idx, w1, b1, w2, b2, *, batch_tile=None):
    B, S, E = h.shape
    T = w1.shape[1]
    P = w2.shape[1]
    TB = batch_tile or _pick_batch_tile(B)
    return pl.pallas_call(
        _tail_kernel,
        out_shape=jax.ShapeDtypeStruct((B, 1), jnp.float32),
        grid_spec=pltpu.PrefetchScalarGridSpec(
            num_scalar_prefetch=0,
            grid=(B // TB,),
            in_specs=[
                pl.BlockSpec((TB, S, E), lambda b: (b, 0, 0)),
                pl.BlockSpec((TB, S), lambda b: (b, 0)),
                pl.BlockSpec((E, T), lambda b: (0, 0)),
                pl.BlockSpec((1, T), lambda b: (0, 0)),
                pl.BlockSpec((T, P), lambda b: (0, 0)),
                pl.BlockSpec((1, P), lambda b: (0, 0)),
            ],
            out_specs=pl.BlockSpec((TB, 1), lambda b: (b, 0)),
        ),
        compiler_params=pltpu.CompilerParams(dimension_semantics=("parallel",)),
    )(h, x_idx, w1, b1, w2, b2)


# ------------------------------- glue / model -------------------------------


def embed(xp, emb_param):
    """result[b, t, :] = emb_param[t, xp[b, t], :]  (torch.gather over the physical dim)."""
    sites = xp.shape[1]
    P = emb_param.shape[1]
    table = emb_param[:sites]                                        # (sites, P, E)
    onehot = jax.nn.one_hot(xp, P, dtype=jnp.float32)                # (B, sites, P)
    return jnp.einsum("btp,tpe->bte", onehot, table)


def init_params(key, *, sites, physical_dim, embedding_dim, heads_num,
                feed_forward_dim, tail_dim, depth):
    E, FF = embedding_dim, feed_forward_dim
    del heads_num  # head split happens inside the kernel on the fused weights
    ks = jax.random.split(key, depth + 2)
    params = {
        "embedding": jax.random.normal(ks[0], (sites + 1, physical_dim, E), jnp.float32)
    }
    s = 0.1
    wqkv, wo, w1, w2, bqkv, b1, vecs = [], [], [], [], [], [], []
    for d in range(depth):
        k = jax.random.split(ks[1 + d], 4)
        wqkv.append(s * jax.random.normal(k[0], (E, 3 * E), jnp.float32))
        wo.append(s * jax.random.normal(k[1], (E, E), jnp.float32))
        w1.append(s * jax.random.normal(k[2], (E, FF), jnp.float32))
        w2.append(s * jax.random.normal(k[3], (FF, E), jnp.float32))
        bqkv.append(jnp.zeros((1, 3 * E), jnp.float32))
        b1.append(jnp.zeros((1, FF), jnp.float32))
        vecs.append(jnp.stack([                      # bo, ln1_g, ln1_b, b2, ln2_g, ln2_b
            jnp.zeros((E,), jnp.float32),
            jnp.ones((E,), jnp.float32),
            jnp.zeros((E,), jnp.float32),
            jnp.zeros((E,), jnp.float32),
            jnp.ones((E,), jnp.float32),
            jnp.zeros((E,), jnp.float32),
        ]))
    params["stack"] = dict(
        wqkv=jnp.stack(wqkv).astype(jnp.bfloat16),
        bqkv=jnp.stack(bqkv),
        wo=jnp.stack(wo).astype(jnp.bfloat16),
        w1=jnp.stack(w1).astype(jnp.bfloat16),
        b1=jnp.stack(b1),
        w2=jnp.stack(w2).astype(jnp.bfloat16),
        vecs=jnp.stack(vecs),
    )
    kt = jax.random.split(ks[-1], 2)
    params["tail_w1"] = (s * jax.random.normal(kt[0], (E, tail_dim), jnp.float32)).astype(jnp.bfloat16)
    params["tail_b1"] = jnp.zeros((1, tail_dim), jnp.float32)
    params["tail_w2"] = (s * jax.random.normal(kt[1], (tail_dim, physical_dim), jnp.float32)).astype(jnp.bfloat16)
    params["tail_b2"] = jnp.zeros((1, physical_dim), jnp.float32)
    return params


def wavefunction_forward(x, params, *, heads_num):
    """Mirror of WaveFunction.forward (real tail): x int [B, L1, L2, orbit] -> psi [B]."""
    B = x.shape[0]
    x_flat = x.reshape(B, -1).astype(jnp.int32)                      # (B, sites)
    xp = jnp.concatenate(
        [jnp.zeros((B, 1), jnp.int32), x_flat[:, :-1]], axis=1
    )                                                                # shifted input
    h = embed(xp, params["embedding"])                               # (B, sites, E)
    h = decoder_stack(h, params["stack"], heads_num=heads_num)       # all layers, one call
    psi = tail_psi(
        h, x_flat,
        params["tail_w1"], params["tail_b1"],
        params["tail_w2"], params["tail_b2"],
    )
    return psi[:, 0]                                                 # (B,)


if __name__ == "__main__":
    # small config consistent with the module's constructor
    L1, L2, orbit_num = 2, 2, 2
    physical_dim = 2
    embedding_dim = 32
    heads_num = 2
    feed_forward_dim = 64
    tail_dim = 16
    depth = 2
    sites = L1 * L2 * orbit_num
    batch = 8

    key = jax.random.PRNGKey(0)
    kx, kp = jax.random.split(key)
    params = init_params(
        kp, sites=sites, physical_dim=physical_dim, embedding_dim=embedding_dim,
        heads_num=heads_num, feed_forward_dim=feed_forward_dim,
        tail_dim=tail_dim, depth=depth,
    )
    x = jax.random.randint(kx, (batch, L1, L2, orbit_num), 0, physical_dim, dtype=jnp.int32)

    psi = wavefunction_forward(x, params, heads_num=heads_num)
    psi = jax.block_until_ready(psi)
    assert psi.shape == (batch,)
    assert bool(jnp.all(jnp.isfinite(psi)))
    print("KERNEL_OK")
</pallas_src>

<mosaic_0001>
module attributes {stable_mosaic.version = 11 : i64} {
  func.func @_decoder_stack_kernel(%arg0: i32, %arg1: i32, %arg2: memref<8x8x32xf32, #tpu.memory_space<vmem>>, %arg3: memref<1x32x96xbf16, #tpu.memory_space<vmem>>, %arg4: memref<1x1x96xf32, #tpu.memory_space<vmem>>, %arg5: memref<1x32x32xbf16, #tpu.memory_space<vmem>>, %arg6: memref<1x32x64xbf16, #tpu.memory_space<vmem>>, %arg7: memref<1x1x64xf32, #tpu.memory_space<vmem>>, %arg8: memref<1x64x32xbf16, #tpu.memory_space<vmem>>, %arg9: memref<1x6x32xf32, #tpu.memory_space<vmem>>, %arg10: memref<8x8x32xf32, #tpu.memory_space<vmem>>, %arg11: memref<64x32xf32, #tpu.memory_space<vmem>>) attributes {dimension_semantics = [#tpu.dimension_semantics<parallel>, #tpu.dimension_semantics<arbitrary>], iteration_bounds = array<i64: 1, 2>, scalar_prefetch = 0 : i64, scratch_operands = 1 : i64, tpu.core_type = #tpu.core_type<tc>, window_params = [{transform_indices = @transform_0, window_bounds = array<i64: 8, 8, 32>}, {transform_indices = @transform_1, window_bounds = array<i64: 1, 32, 96>}, {transform_indices = @transform_2, window_bounds = array<i64: 1, 1, 96>}, {transform_indices = @transform_3, window_bounds = array<i64: 1, 32, 32>}, {transform_indices = @transform_4, window_bounds = array<i64: 1, 32, 64>}, {transform_indices = @transform_5, window_bounds = array<i64: 1, 1, 64>}, {transform_indices = @transform_6, window_bounds = array<i64: 1, 64, 32>}, {transform_indices = @transform_7, window_bounds = array<i64: 1, 6, 32>}, {transform_indices = @transform_8, window_bounds = array<i64: 8, 8, 32>}]} {
    %c0_i32 = arith.constant 0 : i32
    %0 = arith.cmpi eq, %arg1, %c0_i32 : i32
    %1 = arith.extui %0 : i1 to i32
    %c0_i32_0 = arith.constant 0 : i32
    %2 = arith.cmpi ne, %1, %c0_i32_0 : i32
    scf.if %2 {
      %c0_52 = arith.constant 0 : index
      %c0_53 = arith.constant 0 : index
      %c0_54 = arith.constant 0 : index
      %154 = vector.load %arg2[%c0_52, %c0_53, %c0_54] : memref<8x8x32xf32, #tpu.memory_space<vmem>>, vector<8x8x32xf32>
      %155 = vector.shape_cast %154 : vector<8x8x32xf32> to vector<64x32xf32>
      %c0_55 = arith.constant 0 : index
      %c0_56 = arith.constant 0 : index
      %156 = vector.load %arg11[%c0_55, %c0_56] : memref<64x32xf32, #tpu.memory_space<vmem>>, vector<64x32xf32>
      tpu.vector_store %arg11[%c0_55, %c0_56], %155 {strides = array<i32>} : memref<64x32xf32, #tpu.memory_space<vmem>>, vector<64x32xf32>,
    } else {
    }
    %c0 = arith.constant 0 : index
    %c0_1 = arith.constant 0 : index
    %3 = vector.load %arg11[%c0, %c0_1] : memref<64x32xf32, #tpu.memory_space<vmem>>, vector<64x32xf32>
    %4 = arith.truncf %3 : vector<64x32xf32> to vector<64x32xbf16>
    %c0_2 = arith.constant 0 : index
    %c0_3 = arith.constant 0 : index
    %c0_4 = arith.constant 0 : index
    %5 = vector.load %arg9[%c0_2, %c0_3, %c0_4] : memref<1x6x32xf32, #tpu.memory_space<vmem>>, vector<1x6x32xf32>
    %6 = vector.shape_cast %5 : vector<1x6x32xf32> to vector<6x32xf32>
    %7 = vector.extract_strided_slice %6 {offsets = [0, 0], sizes = [1, 32], strides = [1, 1]} : vector<6x32xf32> to vector<1x32xf32>
    %8 = vector.extract_strided_slice %6 {offsets = [1, 0], sizes = [1, 32], strides = [1, 1]} : vector<6x32xf32> to vector<1x32xf32>
    %9 = vector.extract_strided_slice %6 {offsets = [2, 0], sizes = [1, 32], strides = [1, 1]} : vector<6x32xf32> to vector<1x32xf32>
    %10 = vector.extract_strided_slice %6 {offsets = [3, 0], sizes = [1, 32], strides = [1, 1]} : vector<6x32xf32> to vector<1x32xf32>
    %11 = vector.extract_strided_slice %6 {offsets = [4, 0], sizes = [1, 32], strides = [1, 1]} : vector<6x32xf32> to vector<1x32xf32>
    %12 = vector.extract_strided_slice %6 {offsets = [5, 0], sizes = [1, 32], strides = [1, 1]} : vector<6x32xf32> to vector<1x32xf32>
    %c0_5 = arith.constant 0 : index
    %c0_6 = arith.constant 0 : index
    %c0_7 = arith.constant 0 : index
    %13 = vector.load %arg3[%c0_5, %c0_6, %c0_7] : memref<1x32x96xbf16, #tpu.memory_space<vmem>>, vector<1x32x96xbf16>
    %14 = vector.shape_cast %13 : vector<1x32x96xbf16> to vector<32x96xbf16>
    %cst = arith.constant dense<0.000000e+00> : vector<64x96xf32>
    %15 = tpu.matmul %4, %14, %cst {dimension_numbers = #tpu.dot_dimension_numbers<[1], [0], [0], [1], [0, 0, 1, 1], [], []>} : vector<64x32xbf16>, vector<32x96xbf16>, vector<64x96xf32> -> vector<64x96xf32>
    %c0_8 = arith.constant 0 : index
    %c0_9 = arith.constant 0 : index
    %c0_10 = arith.constant 0 : index
    %16 = vector.load %arg4[%c0_8, %c0_9, %c0_10] : memref<1x1x96xf32, #tpu.memory_space<vmem>>, vector<1x1x96xf32>
    %17 = vector.shape_cast %16 : vector<1x1x96xf32> to vector<1x96xf32>
    %18 = vector.broadcast %17 : vector<1x96xf32> to vector<64x96xf32>
    %19 = arith.addf %15, %18 : vector<64x96xf32>
    %20 = vector.extract_strided_slice %19 {offsets = [0, 0], sizes = [64, 32], strides = [1, 1]} : vector<64x96xf32> to vector<64x32xf32>
    %21 = vector.shape_cast %20 : vector<64x32xf32> to vector<8x8x32xf32>
    %22 = vector.extract_strided_slice %19 {offsets = [0, 32], sizes = [64, 32], strides = [1, 1]} : vector<64x96xf32> to vector<64x32xf32>
    %23 = vector.shape_cast %22 : vector<64x32xf32> to vector<8x8x32xf32>
    %24 = vector.extract_strided_slice %19 {offsets = [0, 64], sizes = [64, 32], strides = [1, 1]} : vector<64x96xf32> to vector<64x32xf32>
    %25 = vector.shape_cast %24 : vector<64x32xf32> to vector<8x8x32xf32>
    %26 = tpu.iota {dimensions = array<i32: 0>} : vector<8x8xi32>
    %27 = tpu.iota {dimensions = array<i32: 1>} : vector<8x8xi32>
    %28 = arith.cmpi sge, %26, %27 : vector<8x8xi32>
    %29 = vector.shape_cast %28 : vector<8x8xi1> to vector<1x8x8xi1>
    %30 = vector.extract_strided_slice %21 {offsets = [0, 0, 0], sizes = [8, 8, 16], strides = [1, 1, 1]} : vector<8x8x32xf32> to vector<8x8x16xf32>
    %31 = arith.truncf %30 : vector<8x8x16xf32> to vector<8x8x16xbf16>
    %32 = vector.extract_strided_slice %23 {offsets = [0, 0, 0], sizes = [8, 8, 16], strides = [1, 1, 1]} : vector<8x8x32xf32> to vector<8x8x16xf32>
    %33 = arith.truncf %32 : vector<8x8x16xf32> to vector<8x8x16xbf16>
    %34 = vector.extract_strided_slice %25 {offsets = [0, 0, 0], sizes = [8, 8, 16], strides = [1, 1, 1]} : vector<8x8x32xf32> to vector<8x8x16xf32>
    %35 = arith.truncf %34 : vector<8x8x16xf32> to vector<8x8x16xbf16>
    "tpu.trace_start"() <{level = 10 : i32, message = "bqd,bkd->bqk"}> : () -> ()
    %cst_11 = arith.constant dense<0.000000e+00> : vector<8x8x8xf32>
    %36 = tpu.matmul %31, %33, %cst_11 {dimension_numbers = #tpu.dot_dimension_numbers<[2], [2], [1], [1], [0, 0, 0, 1, 1, 1], [0], [0]>} : vector<8x8x16xbf16>, vector<8x8x16xbf16>, vector<8x8x8xf32> -> vector<8x8x8xf32>
    "tpu.trace_stop"() : () -> ()
    %cst_12 = arith.constant 2.500000e-01 : f32
    %37 = vector.broadcast %cst_12 : f32 to vector<8x8x8xf32>
    %38 = arith.mulf %36, %37 : vector<8x8x8xf32>
    %cst_13 = arith.constant -1.000000e+30 : f32
    %39 = vector.shape_cast %29 : vector<1x8x8xi1> to vector<1x8x8xi1>
    %40 = vector.broadcast %39 : vector<1x8x8xi1> to vector<8x8x8xi1>
    %41 = vector.broadcast %cst_13 : f32 to vector<8x8x8xf32>
    %42 = arith.select %40, %38, %41 : vector<8x8x8xi1>, vector<8x8x8xf32>
    %cst_14 = arith.constant dense<0xFF800000> : vector<8x8xf32>
    %43 = vector.multi_reduction <maximumf>, %42, %cst_14 [2] : vector<8x8x8xf32> to vector<8x8xf32>
    %44 = vector.shape_cast %43 : vector<8x8xf32> to vector<8x8x1xf32>
    %45 = vector.broadcast %44 : vector<8x8x1xf32> to vector<8x8x8xf32>
    %46 = arith.subf %42, %45 : vector<8x8x8xf32>
    %47 = math.exp %46 : vector<8x8x8xf32>
    %cst_15 = arith.constant dense<0.000000e+00> : vector<8x8xf32>
    %48 = vector.multi_reduction <add>, %47, %cst_15 [2] : vector<8x8x8xf32> to vector<8x8xf32>
    %49 = vector.shape_cast %48 : vector<8x8xf32> to vector<8x8x1xf32>
    %50 = tpu.reciprocal %49 {approx = true} : vector<8x8x1xf32> -> vector<8x8x1xf32>
    %51 = vector.broadcast %50 : vector<8x8x1xf32> to vector<8x8x8xf32>
    %52 = arith.mulf %47, %51 : vector<8x8x8xf32>
    %53 = arith.truncf %52 : vector<8x8x8xf32> to vector<8x8x8xbf16>
    "tpu.trace_start"() <{level = 10 : i32, message = "bqk,bkd->bqd"}> : () -> ()
    %cst_16 = arith.constant dense<0.000000e+00> : vector<8x8x16xf32>
    %54 = tpu.matmul %53, %35, %cst_16 {dimension_numbers = #tpu.dot_dimension_numbers<[2], [1], [1], [2], [0, 0, 0, 1, 1, 2], [0], [0]>} : vector<8x8x8xbf16>, vector<8x8x16xbf16>, vector<8x8x16xf32> -> vector<8x8x16xf32>
    "tpu.trace_stop"() : () -> ()
    %55 = vector.extract_strided_slice %21 {offsets = [0, 0, 16], sizes = [8, 8, 16], strides = [1, 1, 1]} : vector<8x8x32xf32> to vector<8x8x16xf32>
    %56 = arith.truncf %55 : vector<8x8x16xf32> to vector<8x8x16xbf16>
    %57 = vector.extract_strided_slice %23 {offsets = [0, 0, 16], sizes = [8, 8, 16], strides = [1, 1, 1]} : vector<8x8x32xf32> to vector<8x8x16xf32>
    %58 = arith.truncf %57 : vector<8x8x16xf32> to vector<8x8x16xbf16>
    %59 = vector.extract_strided_slice %25 {offsets = [0, 0, 16], sizes = [8, 8, 16], strides = [1, 1, 1]} : vector<8x8x32xf32> to vector<8x8x16xf32>
    %60 = arith.truncf %59 : vector<8x8x16xf32> to vector<8x8x16xbf16>
    "tpu.trace_start"() <{level = 10 : i32, message = "bqd,bkd->bqk"}> : () -> ()
    %cst_17 = arith.constant dense<0.000000e+00> : vector<8x8x8xf32>
    %61 = tpu.matmul %56, %58, %cst_17 {dimension_numbers = #tpu.dot_dimension_numbers<[2], [2], [1], [1], [0, 0, 0, 1, 1, 1], [0], [0]>} : vector<8x8x16xbf16>, vector<8x8x16xbf16>, vector<8x8x8xf32> -> vector<8x8x8xf32>
    "tpu.trace_stop"() : () -> ()
    %cst_18 = arith.constant 2.500000e-01 : f32
    %62 = vector.broadcast %cst_18 : f32 to vector<8x8x8xf32>
    %63 = arith.mulf %61, %62 : vector<8x8x8xf32>
    %cst_19 = arith.constant -1.000000e+30 : f32
    %64 = vector.shape_cast %29 : vector<1x8x8xi1> to vector<1x8x8xi1>
    %65 = vector.broadcast %64 : vector<1x8x8xi1> to vector<8x8x8xi1>
    %66 = vector.broadcast %cst_19 : f32 to vector<8x8x8xf32>
    %67 = arith.select %65, %63, %66 : vector<8x8x8xi1>, vector<8x8x8xf32>
    %cst_20 = arith.constant dense<0xFF800000> : vector<8x8xf32>
    %68 = vector.multi_reduction <maximumf>, %67, %cst_20 [2] : vector<8x8x8xf32> to vector<8x8xf32>
    %69 = vector.shape_cast %68 : vector<8x8xf32> to vector<8x8x1xf32>
    %70 = vector.broadcast %69 : vector<8x8x1xf32> to vector<8x8x8xf32>
    %71 = arith.subf %67, %70 : vector<8x8x8xf32>
    %72 = math.exp %71 : vector<8x8x8xf32>
    %cst_21 = arith.constant dense<0.000000e+00> : vector<8x8xf32>
    %73 = vector.multi_reduction <add>, %72, %cst_21 [2] : vector<8x8x8xf32> to vector<8x8xf32>
    %74 = vector.shape_cast %73 : vector<8x8xf32> to vector<8x8x1xf32>
    %75 = tpu.reciprocal %74 {approx = true} : vector<8x8x1xf32> -> vector<8x8x1xf32>
    %76 = vector.broadcast %75 : vector<8x8x1xf32> to vector<8x8x8xf32>
    %77 = arith.mulf %72, %76 : vector<8x8x8xf32>
    %78 = arith.truncf %77 : vector<8x8x8xf32> to vector<8x8x8xbf16>
    "tpu.trace_start"() <{level = 10 : i32, message = "bqk,bkd->bqd"}> : () -> ()
    %cst_22 = arith.constant dense<0.000000e+00> : vector<8x8x16xf32>
    %79 = tpu.matmul %78, %60, %cst_22 {dimension_numbers = #tpu.dot_dimension_numbers<[2], [1], [1], [2], [0, 0, 0, 1, 1, 2], [0], [0]>} : vector<8x8x8xbf16>, vector<8x8x16xbf16>, vector<8x8x16xf32> -> vector<8x8x16xf32>
    "tpu.trace_stop"() : () -> ()
    %80 = tpu.concatenate %54, %79 in 2 : vector<8x8x16xf32>, vector<8x8x16xf32> -> vector<8x8x32xf32>
    %81 = vector.shape_cast %80 : vector<8x8x32xf32> to vector<64x32xf32>
    %82 = arith.truncf %81 : vector<64x32xf32> to vector<64x32xbf16>
    %c0_23 = arith.constant 0 : index
    %c0_24 = arith.constant 0 : index
    %c0_25 = arith.constant 0 : index
    %83 = vector.load %arg5[%c0_23, %c0_24, %c0_25] : memref<1x32x32xbf16, #tpu.memory_space<vmem>>, vector<1x32x32xbf16>
    %84 = vector.shape_cast %83 : vector<1x32x32xbf16> to vector<32x32xbf16>
    %cst_26 = arith.constant dense<0.000000e+00> : vector<64x32xf32>
    %85 = tpu.matmul %82, %84, %cst_26 {dimension_numbers = #tpu.dot_dimension_numbers<[1], [0], [0], [1], [0, 0, 1, 1], [], []>} : vector<64x32xbf16>, vector<32x32xbf16>, vector<64x32xf32> -> vector<64x32xf32>
    %86 = vector.broadcast %7 : vector<1x32xf32> to vector<64x32xf32>
    %87 = arith.addf %85, %86 : vector<64x32xf32>
    %88 = arith.addf %3, %87 : vector<64x32xf32>
    %cst_27 = arith.constant dense<0.000000e+00> : vector<64xf32>
    %89 = vector.multi_reduction <add>, %88, %cst_27 [1] : vector<64x32xf32> to vector<64xf32>
    %90 = vector.shape_cast %89 : vector<64xf32> to vector<64x1xf32>
    %cst_28 = arith.constant 3.200000e+01 : f32
    %91 = vector.broadcast %cst_28 : f32 to vector<64x1xf32>
    %92 = arith.divf %90, %91 : vector<64x1xf32>
    %93 = vector.broadcast %92 : vector<64x1xf32> to vector<64x32xf32>
    %94 = arith.subf %88, %93 : vector<64x32xf32>
    %95 = arith.mulf %94, %94 : vector<64x32xf32>
    %cst_29 = arith.constant dense<0.000000e+00> : vector<64xf32>
    %96 = vector.multi_reduction <add>, %95, %cst_29 [1] : vector<64x32xf32> to vector<64xf32>
    %97 = vector.shape_cast %96 : vector<64xf32> to vector<64x1xf32>
    %cst_30 = arith.constant 3.200000e+01 : f32
    %98 = vector.broadcast %cst_30 : f32 to vector<64x1xf32>
    %99 = arith.divf %97, %98 : vector<64x1xf32>
    %100 = vector.broadcast %92 : vector<64x1xf32> to vector<64x32xf32>
    %101 = arith.subf %88, %100 : vector<64x32xf32>
    %cst_31 = arith.constant 9.99999974E-6 : f32
    %102 = vector.broadcast %cst_31 : f32 to vector<64x1xf32>
    %103 = arith.addf %99, %102 : vector<64x1xf32>
    %104 = math.rsqrt %103 : vector<64x1xf32>
    %105 = vector.broadcast %104 : vector<64x1xf32> to vector<64x32xf32>
    %106 = arith.mulf %101, %105 : vector<64x32xf32>
    %107 = vector.broadcast %8 : vector<1x32xf32> to vector<64x32xf32>
    %108 = arith.mulf %106, %107 : vector<64x32xf32>
    %109 = vector.broadcast %9 : vector<1x32xf32> to vector<64x32xf32>
    %110 = arith.addf %108, %109 : vector<64x32xf32>
    %111 = arith.truncf %110 : vector<64x32xf32> to vector<64x32xbf16>
    %c0_32 = arith.constant 0 : index
    %c0_33 = arith.constant 0 : index
    %c0_34 = arith.constant 0 : index
    %112 = vector.load %arg6[%c0_32, %c0_33, %c0_34] : memref<1x32x64xbf16, #tpu.memory_space<vmem>>, vector<1x32x64xbf16>
    %113 = vector.shape_cast %112 : vector<1x32x64xbf16> to vector<32x64xbf16>
    %cst_35 = arith.constant dense<0.000000e+00> : vector<64x64xf32>
    %114 = tpu.matmul %111, %113, %cst_35 {dimension_numbers = #tpu.dot_dimension_numbers<[1], [0], [0], [1], [0, 0, 1, 1], [], []>} : vector<64x32xbf16>, vector<32x64xbf16>, vector<64x64xf32> -> vector<64x64xf32>
    %c0_36 = arith.constant 0 : index
    %c0_37 = arith.constant 0 : index
    %c0_38 = arith.constant 0 : index
    %115 = vector.load %arg7[%c0_36, %c0_37, %c0_38] : memref<1x1x64xf32, #tpu.memory_space<vmem>>, vector<1x1x64xf32>
    %116 = vector.shape_cast %115 : vector<1x1x64xf32> to vector<1x64xf32>
    %117 = vector.broadcast %116 : vector<1x64xf32> to vector<64x64xf32>
    %118 = arith.addf %114, %117 : vector<64x64xf32>
    %cst_39 = arith.constant 0.000000e+00 : f32
    %119 = vector.broadcast %cst_39 : f32 to vector<64x64xf32>
    %120 = arith.maximumf %118, %119 : vector<64x64xf32>
    %121 = arith.truncf %120 : vector<64x64xf32> to vector<64x64xbf16>
    %c0_40 = arith.constant 0 : index
    %c0_41 = arith.constant 0 : index
    %c0_42 = arith.constant 0 : index
    %122 = vector.load %arg8[%c0_40, %c0_41, %c0_42] : memref<1x64x32xbf16, #tpu.memory_space<vmem>>, vector<1x64x32xbf16>
    %123 = vector.shape_cast %122 : vector<1x64x32xbf16> to vector<64x32xbf16>
    %cst_43 = arith.constant dense<0.000000e+00> : vector<64x32xf32>
    %124 = tpu.matmul %121, %123, %cst_43 {dimension_numbers = #tpu.dot_dimension_numbers<[1], [0], [0], [1], [0, 0, 1, 1], [], []>} : vector<64x64xbf16>, vector<64x32xbf16>, vector<64x32xf32> -> vector<64x32xf32>
    %125 = vector.broadcast %10 : vector<1x32xf32> to vector<64x32xf32>
    %126 = arith.addf %124, %125 : vector<64x32xf32>
    %127 = arith.addf %110, %126 : vector<64x32xf32>
    %cst_44 = arith.constant dense<0.000000e+00> : vector<64xf32>
    %128 = vector.multi_reduction <add>, %127, %cst_44 [1] : vector<64x32xf32> to vector<64xf32>
    %129 = vector.shape_cast %128 : vector<64xf32> to vector<64x1xf32>
    %cst_45 = arith.constant 3.200000e+01 : f32
    %130 = vector.broadcast %cst_45 : f32 to vector<64x1xf32>
    %131 = arith.divf %129, %130 : vector<64x1xf32>
    %132 = vector.broadcast %131 : vector<64x1xf32> to vector<64x32xf32>
    %133 = arith.subf %127, %132 : vector<64x32xf32>
    %134 = arith.mulf %133, %133 : vector<64x32xf32>
    %cst_46 = arith.constant dense<0.000000e+00> : vector<64xf32>
    %135 = vector.multi_reduction <add>, %134, %cst_46 [1] : vector<64x32xf32> to vector<64xf32>
    %136 = vector.shape_cast %135 : vector<64xf32> to vector<64x1xf32>
    %cst_47 = arith.constant 3.200000e+01 : f32
    %137 = vector.broadcast %cst_47 : f32 to vector<64x1xf32>
    %138 = arith.divf %136, %137 : vector<64x1xf32>
    %139 = vector.broadcast %131 : vector<64x1xf32> to vector<64x32xf32>
    %140 = arith.subf %127, %139 : vector<64x32xf32>
    %cst_48 = arith.constant 9.99999974E-6 : f32
    %141 = vector.broadcast %cst_48 : f32 to vector<64x1xf32>
    %142 = arith.addf %138, %141 : vector<64x1xf32>
    %143 = math.rsqrt %142 : vector<64x1xf32>
    %144 = vector.broadcast %143 : vector<64x1xf32> to vector<64x32xf32>
    %145 = arith.mulf %140, %144 : vector<64x32xf32>
    %146 = vector.broadcast %11 : vector<1x32xf32> to vector<64x32xf32>
    %147 = arith.mulf %145, %146 : vector<64x32xf32>
    %148 = vector.broadcast %12 : vector<1x32xf32> to vector<64x32xf32>
    %149 = arith.addf %147, %148 : vector<64x32xf32>
    %c0_49 = arith.constant 0 : index
    %c0_50 = arith.constant 0 : index
    %150 = vector.load %arg11[%c0_49, %c0_50] : memref<64x32xf32, #tpu.memory_space<vmem>>, vector<64x32xf32>
    tpu.vector_store %arg11[%c0_49, %c0_50], %149 {strides = array<i32>} : memref<64x32xf32, #tpu.memory_space<vmem>>, vector<64x32xf32>,
    %c1_i32 = arith.constant 1 : i32
    %151 = arith.cmpi eq, %arg1, %c1_i32 : i32
    %152 = arith.extui %151 : i1 to i32
    %c0_i32_51 = arith.constant 0 : i32
    %153 = arith.cmpi ne, %152, %c0_i32_51 : i32
    scf.if %153 {
      %154 = vector.shape_cast %149 : vector<64x32xf32> to vector<8x8x32xf32>
      %c0_52 = arith.constant 0 : index
      %c0_53 = arith.constant 0 : index
      %c0_54 = arith.constant 0 : index
      %155 = vector.load %arg10[%c0_52, %c0_53, %c0_54] : memref<8x8x32xf32, #tpu.memory_space<vmem>>, vector<8x8x32xf32>
      tpu.vector_store %arg10[%c0_52, %c0_53, %c0_54], %154 {strides = array<i32>} : memref<8x8x32xf32, #tpu.memory_space<vmem>>, vector<8x8x32xf32>,
    } else {
    }
    return
  }
  func.func @transform_0(%arg0: i32, %arg1: i32) -> (i32, i32, i32) {
    %c0_i32 = arith.constant 0 : i32
    %c0_i32_0 = arith.constant 0 : i32
    %c0_i32_1 = arith.constant 0 : i32
    return %arg0, %c0_i32, %c0_i32_0 : i32, i32, i32
  }
  func.func @transform_1(%arg0: i32, %arg1: i32) -> (i32, i32, i32) {
    %c0_i32 = arith.constant 0 : i32
    %c0_i32_0 = arith.constant 0 : i32
    %c0_i32_1 = arith.constant 0 : i32
    return %arg1, %c0_i32, %c0_i32_0 : i32, i32, i32
  }
  func.func @transform_2(%arg0: i32, %arg1: i32) -> (i32, i32, i32) {
    %c0_i32 = arith.constant 0 : i32
    %c0_i32_0 = arith.constant 0 : i32
    %c0_i32_1 = arith.constant 0 : i32
    return %arg1, %c0_i32, %c0_i32_0 : i32, i32, i32
  }
  func.func @transform_3(%arg0: i32, %arg1: i32) -> (i32, i32, i32) {
    %c0_i32 = arith.constant 0 : i32
    %c0_i32_0 = arith.constant 0 : i32
    %c0_i32_1 = arith.constant 0 : i32
    return %arg1, %c0_i32, %c0_i32_0 : i32, i32, i32
  }
  func.func @transform_4(%arg0: i32, %arg1: i32) -> (i32, i32, i32) {
    %c0_i32 = arith.constant 0 : i32
    %c0_i32_0 = arith.constant 0 : i32
    %c0_i32_1 = arith.constant 0 : i32
    return %arg1, %c0_i32, %c0_i32_0 : i32, i32, i32
  }
  func.func @transform_5(%arg0: i32, %arg1: i32) -> (i32, i32, i32) {
    %c0_i32 = arith.constant 0 : i32
    %c0_i32_0 = arith.constant 0 : i32
    %c0_i32_1 = arith.constant 0 : i32
    return %arg1, %c0_i32, %c0_i32_0 : i32, i32, i32
  }
  func.func @transform_6(%arg0: i32, %arg1: i32) -> (i32, i32, i32) {
    %c0_i32 = arith.constant 0 : i32
    %c0_i32_0 = arith.constant 0 : i32
    %c0_i32_1 = arith.constant 0 : i32
    return %arg1, %c0_i32, %c0_i32_0 : i32, i32, i32
  }
  func.func @transform_7(%arg0: i32, %arg1: i32) -> (i32, i32, i32) {
    %c0_i32 = arith.constant 0 : i32
    %c0_i32_0 = arith.constant 0 : i32
    %c0_i32_1 = arith.constant 0 : i32
    return %arg1, %c0_i32, %c0_i32_0 : i32, i32, i32
  }
  func.func @transform_8(%arg0: i32, %arg1: i32) -> (i32, i32, i32) {
    %c0_i32 = arith.constant 0 : i32
    %c0_i32_0 = arith.constant 0 : i32
    %c0_i32_1 = arith.constant 0 : i32
    return %arg0, %c0_i32, %c0_i32_0 : i32, i32, i32
  }
}

</mosaic_0001>

<bundles_post_ra>
// kernel: tpu_custom_call.1
= control target key start
LH: loop header
LB: loop body
LE: loop exit
PB: predicated region body
PF: predicated region fallthrough
CT: control target
= control target key end

     0   :  { %s5548_s0 = inlined_call_operand.hbm [shape: f32[8,8,32], index: 0, kind: input, shape index: {}]   ;;  %s5549_s1 = inlined_call_operand.hbm [shape: bf16[2,32,96], index: 1, kind: input, shape index: {}]   ;;  %s5550_s2 = inlined_call_operand.hbm [shape: f32[2,1,96], index: 2, kind: input, shape index: {}]   ;;  %s5551_s3 = inlined_call_operand.hbm [shape: bf16[2,32,32], index: 3, kind: input, shape index: {}]   ;;  %s5552_s4 = inlined_call_operand.hbm [shape: bf16[2,32,64], index: 4, kind: input, shape index: {}]   ;;  %s5553_s5 = inlined_call_operand.hbm [shape: f32[2,1,64], index: 5, kind: input, shape index: {}]   ;;  %s5554_s6 = inlined_call_operand.hbm [shape: bf16[2,64,32], index: 6, kind: input, shape index: {}]   ;;  %s5555_s7 = inlined_call_operand.hbm [shape: f32[2,6,32], index: 7, kind: input, shape index: {}]   ;;  %s5556_s8 = inlined_call_operand.hbm [shape: f32[8,8,32], index: 8, kind: output, shape index: {}]  }
   0x1   :  { %5575 = sst [smem:[#allocation29_spill]] %s5549_s1 }
   0x2   :  { %5576 = sst [smem:[#allocation30_spill]] %s5551_s3 }
   0x3   :  { %5577 = sst [smem:[#allocation31_spill]] %s5553_s5 }
   0x4   :  { %5578 = sst [smem:[#allocation32_spill]] %s5556_s8 }
   0x5   :  { %13 = vsyncpa [#allocation4], 0 }
   0x6   :  { %14 = vsyncpa [#allocation7], 0 }
   0x7   :  { %16 = vsyncpa [#allocation7 + $0x1], 0 }
   0x8   :  { %17 = vsyncpa [#allocation10], 0 }
   0x9   :  { %19 = vsyncpa [#allocation10 + $0x1], 0 }
   0xa   :  { %20 = vsyncpa [#allocation13], 0 }
   0xb   :  { %22 = vsyncpa [#allocation13 + $0x1], 0 }
   0xc   :  { %23 = vsyncpa [#allocation16], 0 }
   0xd   :  { %25 = vsyncpa [#allocation16 + $0x1], 0 }
   0xe   :  { %26 = vsyncpa [#allocation5], 0  ;;  %s4472_s27 = smov 0   ;;  %s4474_s28 = smov 0  }
   0xf   :  { %s4476_s29 = smov 0   ;;  %s4478_s30 = smov 0  }
  0x10   :  { %s4480_s9 = smov 0   ;;  %s4482_s10 = smov 0  }
  0x11 LB: > { %5579 = sst [smem:[#allocation24_spill]] %s4390_s29  ;;  %s41_s11 = sadd.s32 1, %s4398_s9  ;;  %s4402_s10 = sphi %s4482_s10, %s32_s10   ;;  %s4398_s9 = sphi %s4480_s9, %s5619_s9   ;;  %s4394_s30 = sphi %s4478_s30, %s5618_s30   ;;  %s4390_s29 = sphi %s4476_s29, %s5614_s29   ;;  %s4386_s28 = sphi %s4474_s28, %s5617_s28   ;;  %s4382_s27 = sphi %s4472_s27, %s5616_s27  }
  0x12   : > { %5580 = sst [smem:[#allocation25_spill]] %s4394_s30  ;;  %s77_s12 = sadd.s32 1, %s4390_s29 }
  0x13   : > { %5581 = sst [smem:[#allocation26_spill]] %s4402_s10  ;;  %p42_p0 = scmp.ge.s32.totalorder %s41_s11, 2 }
  0x14   : > { %p84_p1 = scmp.ne.s32.totalorder %s4390_s29, %s4386_s28  ;;  %p85_p2 = scmp.eq.s32.totalorder %s4402_s10, 0 }
  0x15   : > { %s5621_s11 = smov (%p42_p0, %s41_s11), 0  ;;  %p3866_p4 = scmp.lt.s32.totalorder %s4402_s10, 2 }
  0x16   : > { %5582 = sst [smem:[#allocation27_spill]] %s5621_s11  ;;  %p86_p3 = por %p85_p2, %p84_p1 }
  0x17   : > { %s74_s13 = ssub.s32 %s4398_s9, %s5621_s11  ;;  %s4513_s14 = sand.u32 1, %s4402_s10  }
  0x18   : > { %p75_p5 = scmp.eq.s32.totalorder %s74_s13, 0  ;;  %s4516_s15 = sand.u32 1, %s4390_s29  }
  0x19   : > { %s4519_s16 = sshll.u32 %s4398_s9, 8  ;;  %s4525_s18 = sshll.u32 %s4516_s15, 4 }
  0x1a   : > { %s4522_s17 = scalar_select %p75_p5, %s4390_s29, %s77_s12  }
  0x1b   : > { %s5584_s1 = sld [smem:[#allocation29_spill]]  ;;  %p4533_p6 = pnand %p3866_p4, %p86_p3 }
  0x1c   : > { %5583 = sst [smem:[#allocation28_spill]] %s4522_s17  ;;  %s316_s23 = scalar_lea.vmem [#allocation6], %s4525_s18 }
  0x1d   : > { %s5585_s22 = scalar_select %p4533_p6, 1, 0 }
  0x1e   : > { %s323_s24 = sshll.u32 %s316_s23, 4  ;;  %p4545_p8 = pneg %p4533_p6  ;;  %s4538_s24 = int_to_ptr.vmem [resolvable:$true] %s323_s24 }
  0x20   : > { %s5586_s12 = scalar_select %p4545_p8, 1, 0 }
  0x21   : > { %s4531_s21 = scalar_lea.hbm %s5584_s1, %s4519_s16  ;;  %s4073_s20 = scalar_lea.hbm %s5584_s1, 512 }
  0x22   : > { %s4068_s26 = scalar_lea.hbm %s4531_s21, 256  ;;  %p4074_p11 = scmp.lt.u32.totalorder %s4531_s21, %s5584_s1 }
  0x23   : > { %p4069_p7 = scmp.ne.s32.totalorder %s4531_s21, %s4068_s26  ;;  %p4075_p12 = scmp.lt.u32.totalorder %s4073_s20, %s4068_s26 }
  0x24   : > { %p4077_p0 = scmp.lt.u32.totalorder %s4068_s26, %s4531_s21 }
  0x25   : > { %p4071_p9 = pnand %p4545_p8, %p4069_p7  ;;  %p4076_p13 = por %p4075_p12, %p4074_p11 }
  0x27   : > { %p4072_p10 = pneg %p4071_p9  ;;  %p4078_p1 = por %p4077_p0, %p4076_p13 }
  0x29   : > { %p4079_p2 = pnand %p4078_p1, %p4072_p10 }
  0x2b   : > { %4082 = shalt.err (!%p4079_p2)
}
  0x2c   : > { %s4083_s25 = scalar_lea.vmem %s4538_s24, 256  ;;  %s4404_s13 = smov [#allocation6]  }
  0x2d   : > { %p4084_p3 = scmp.ne.s32.totalorder %s4538_s24, %s4083_s25  ;;  %s4088_s19 = sshll.u32 %s4404_s13, 4  ;;  %s4089_s19 = int_to_ptr.vmem [resolvable:$false] %s4088_s19 }
  0x2e   : > { %s4090_s11 = scalar_lea.vmem %s4089_s19, 512  ;;  %p4091_p7 = scmp.lt.s32.totalorder %s4538_s24, %s4089_s19 }
  0x2f   : > { %p4086_p4 = pnand %p4084_p3, %p4545_p8  ;;  %p4092_p9 = scmp.lt.s32.totalorder %s4090_s11, %s4083_s25 }
  0x31   : > { %p4087_p5 = pneg %p4086_p4  ;;  %p4093_p11 = por %p4092_p9, %p4091_p7 }
  0x33   : > { %p4094_p12 = pnand %p4093_p11, %p4087_p5 }
  0x35   : > { %4097 = shalt.err (!%p4094_p12)
}
  0x36   : > { %s5560_s26 = smov 64   ;;  %s5563_s20 = smov 4  }
  0x37   : > { %s5587_s25 = scalar_lea.sflag [#allocation7], %s4513_s14  ;;  %s5588_s3 = sld [smem:[#allocation30_spill]] }
  0x38   : > { %3846 = dma.hbm_to_vmem [thread:$0]  (!%p4533_p6), %s4531_s21, 256, %s4538_s24, %s5587_s25, %s5560_s26, %s5560_s26, %s5563_s20  }
  0x39   : > { %s354_s11 = scalar_lea.vmem [#allocation9], %s4525_s18  ;;  %s3389_s17 = sshll.u32 %s4398_s9, 4 }
  0x3a   : > { %s361_s1 = sshll.u32 %s354_s11, 4  ;;  %s4588_s30 = scalar_lea.hbm %s5550_s2, %s3389_s17  ;;  %s4581_s1 = int_to_ptr.vmem [resolvable:$true] %s361_s1 }
  0x3b   : > { %s5562_s21 = scalar_lea.sflag [#allocation10], %s4513_s14 }
  0x3d   : > { %s4577_s19 = scalar_lea.hbm %s5588_s3, %s4519_s16  ;;  %s4103_s13 = scalar_lea.hbm %s5588_s3, 512 }
  0x3e   : > { %s4098_s24 = scalar_lea.hbm %s4577_s19, 256  ;;  %p4104_p1 = scmp.lt.u32.totalorder %s4577_s19, %s5588_s3 }
  0x3f   : > { %p4099_p10 = scmp.ne.s32.totalorder %s4577_s19, %s4098_s24  ;;  %p4105_p2 = scmp.lt.u32.totalorder %s4103_s13, %s4098_s24 }
  0x40   : > { %p4107_p4 = scmp.lt.u32.totalorder %s4098_s24, %s4577_s19 }
  0x41   : > { %p4101_p13 = pnand %p4099_p10, %p4545_p8  ;;  %p4106_p3 = por %p4105_p2, %p4104_p1 }
  0x43   : > { %p4102_p0 = pneg %p4101_p13  ;;  %p4108_p5 = por %p4107_p4, %p4106_p3 }
  0x45   : > { %p4109_p7 = pnand %p4108_p5, %p4102_p0 }
  0x47   : > { %4112 = shalt.err (!%p4109_p7)
}
  0x48   : > { %s4113_s8 = scalar_lea.vmem %s4581_s1, 256  ;;  %s4407_s29 = smov [#allocation9]  }
  0x49   : > { %p4114_p9 = scmp.ne.s32.totalorder %s4581_s1, %s4113_s8  ;;  %s4118_s25 = sshll.u32 %s4407_s29, 4  ;;  %s4119_s25 = int_to_ptr.vmem [resolvable:$false] %s4118_s25 }
  0x4a   : > { %s4120_s26 = scalar_lea.vmem %s4119_s25, 512  ;;  %p4121_p10 = scmp.lt.s32.totalorder %s4581_s1, %s4119_s25 }
  0x4b   : > { %p4116_p11 = pnand %p4114_p9, %p4545_p8  ;;  %p4122_p13 = scmp.lt.s32.totalorder %s4120_s26, %s4113_s8 }
  0x4d   : > { %p4117_p12 = pneg %p4116_p11  ;;  %p4123_p1 = por %p4122_p13, %p4121_p10 }
  0x4f   : > { %p4124_p2 = pnand %p4123_p1, %p4117_p12 }
  0x51   : > { %4127 = shalt.err (!%p4124_p2)
}
  0x52   : > { %s5589_s24 = smov 64   ;;  %s5590_s5 = sld [smem:[#allocation31_spill]] }
  0x53   : > { %3852 = dma.hbm_to_vmem [thread:$0]  (!%p4533_p6), %s4577_s19, 256, %s4581_s1, %s5562_s21, %s5589_s24, %s5589_s24, %s5563_s20  }
  0x54   : > { %s395_s8 = scalar_lea.vmem [#allocation12], %s4516_s15  ;;  %s5567_s25 = scalar_lea.sflag [#allocation13], %s4513_s14 }
  0x55   : > { %s402_s29 = sshll.u32 %s395_s8, 4  ;;  %s403_s29 = int_to_ptr.vmem [resolvable:$true] %s402_s29 }
  0x58   : > { %s4622_s11 = scalar_lea.hbm %s5590_s5, %s3389_s17  ;;  %s4133_s21 = scalar_lea.hbm %s5590_s5, 32 }
  0x59   : > { %s4128_s26 = scalar_lea.hbm %s4622_s11, 16  ;;  %p4134_p5 = scmp.lt.u32.totalorder %s4622_s11, %s5590_s5 }
  0x5a   : > { %p4129_p0 = scmp.ne.s32.totalorder %s4622_s11, %s4128_s26  ;;  %p4135_p7 = scmp.lt.u32.totalorder %s4133_s21, %s4128_s26 }
  0x5b   : > { %p4137_p11 = scmp.lt.u32.totalorder %s4128_s26, %s4622_s11 }
  0x5c   : > { %p4131_p3 = pnand %p4129_p0, %p4545_p8  ;;  %p4136_p9 = por %p4135_p7, %p4134_p5 }
  0x5e   : > { %p4132_p4 = pneg %p4131_p3  ;;  %p4138_p12 = por %p4137_p11, %p4136_p9 }
  0x60   : > { %p4139_p10 = pnand %p4138_p12, %p4132_p4 }
  0x62   : > { %4142 = shalt.err (!%p4139_p10)
}
  0x63   : > { %s4143_s13 = scalar_lea.vmem %s403_s29, 16  ;;  %s4408_s8 = smov [#allocation12]  }
  0x64   : > { %p4144_p13 = scmp.ne.s32.totalorder %s403_s29, %s4143_s13  ;;  %s4148_s20 = sshll.u32 %s4408_s8, 4  ;;  %s4149_s20 = int_to_ptr.vmem [resolvable:$false] %s4148_s20 }
  0x65   : > { %s4150_s1 = scalar_lea.vmem %s4149_s20, 32  ;;  %p4151_p0 = scmp.lt.s32.totalorder %s403_s29, %s4149_s20 }
  0x66   : > { %p4146_p1 = pnand %p4144_p13, %p4545_p8  ;;  %p4152_p3 = scmp.lt.s32.totalorder %s4150_s1, %s4143_s13 }
  0x68   : > { %p4147_p2 = pneg %p4146_p1  ;;  %p4153_p6 = por %p4152_p3, %p4151_p0 }
  0x6a   : > { %p4154_p5 = pnand %p4153_p6, %p4147_p2 }
  0x6c   : > { %4157 = shalt.err (!%p4154_p5)
}
  0x6d   : > { %p5591_p7 = scmp.ne.s32.totalorder %s5585_s22, 0  ;;  %s4646_s21 = sadd.s32 4294967295, %s4402_s10  }
  0x6e   : > { %p90_p6 = scmp.ne.s32.totalorder %s4386_s28, %s4382_s27  ;;  %p5569_p4 = scmp.eq.s32.totalorder %s4646_s21, 0 }
  0x6f   : > { %3858 = dma.hbm_to_vmem [thread:$0]  (!%p5591_p7), %s4622_s11, 16, %s403_s29, %s5567_s25  }
  0x70   : > { %p3383_p9 = scmp.ge.s32.totalorder %s4402_s10, 1  ;;  %p283_p11 = scmp.lt.s32.totalorder %s4402_s10, 3 }
  0x71   : > { %p4655_p12 = por %p5569_p4, %p90_p6  ;;  %s4409_s11 = smov [#allocation3]  }
  0x72   : > { %p4659_p10 = pnand %p3383_p9, %p283_p11  ;;  %s298_s29 = sshll.u32 %s4409_s11, 4  ;;  %s299_s29 = int_to_ptr.vmem [resolvable:$true] %s298_s29 }
  0x73   : > { %s5592_s20 = scalar_select %p4655_p12, 1, 0 }
  0x74   : > { %s5593_s26 = scalar_select %p4659_p10, 1, 0 }
  0x75   : > { %p3839_p13 = pneg %p4659_p10  ;;  %s336_s19 = scalar_lea.vmem [#allocation8], %s4516_s15 }
  0x76   : > { %s343_s23 = sshll.u32 %s336_s19, 4  ;;  %s4678_s8 = scalar_lea.hbm %s5552_s4, %s4519_s16  ;;  %s4672_s23 = int_to_ptr.vmem [resolvable:$true] %s343_s23 }
  0x77   : > { %p4667_p1 = pnand %p3839_p13, %p5569_p4  ;;  %s4158_s25 = scalar_lea.hbm %s5548_s0, 1024 }
  0x78   : > { %p4159_p2 = scmp.ne.s32.totalorder %s5548_s0, %s4158_s25  ;;  %p4165_p6 = scmp.lt.u32.totalorder %s4158_s25, %s5548_s0 }
  0x79   : > { %p4160_p0 = pneg %p4667_p1 }
  0x7b   : > { %p4161_p3 = pnand %p4160_p0, %p4159_p2 }
  0x7d   : > { %p4162_p5 = pneg %p4161_p3 }
  0x7f   : > { %p4167_p9 = pnand %p4165_p6, %p4162_p5 }
  0x81   : > { %4170 = shalt.err (!%p4167_p9)
}
  0x82   : > { %s4171_s16 = scalar_lea.vmem %s299_s29, 1024  ;;  %p4179_p12 = scmp.lt.s32.totalorder %s299_s29, %s299_s29 }
  0x83   : > { %p4172_p11 = scmp.ne.s32.totalorder %s299_s29, %s4171_s16  ;;  %p4180_p10 = scmp.lt.s32.totalorder %s4171_s16, %s4171_s16 }
  0x85   : > { %p4174_p13 = pnand %p4172_p11, %p4160_p0  ;;  %p4181_p7 = por %p4180_p10, %p4179_p12 }
  0x87   : > { %p4175_p4 = pneg %p4174_p13 }
  0x89   : > { %p4182_p8 = pnand %p4181_p7, %p4175_p4 }
  0x8b   : > { %4185 = shalt.err (!%p4182_p8)
}
  0x8c   : > { %s4410_s3 = smov 128   ;;  %s4411_s5 = smov 8  }
  0x8d   : > { %3842 = dma.hbm_to_vmem [thread:$0]  (!%p4667_p1), %s5548_s0, 1024, %s299_s29, [#allocation4], %s4410_s3, %s4410_s3, %s4411_s5  }
  0x8e   : > { %s4186_s17 = scalar_lea.hbm %s4588_s30, 16  ;;  %p5595_p0 = scmp.ne.s32.totalorder %s5586_s12, 0 }
  0x8f   : > { %p4187_p2 = scmp.ne.s32.totalorder %s4588_s30, %s4186_s17  ;;  %s4191_s11 = scalar_lea.hbm %s5550_s2, 32 }
  0x90   : > { %p4192_p8 = scmp.lt.u32.totalorder %s4588_s30, %s5550_s2  ;;  %p4193_p7 = scmp.lt.u32.totalorder %s4191_s11, %s4186_s17 }
  0x91   : > { %p4189_p3 = pnand %p4187_p2, %p5595_p0  ;;  %p4195_p10 = scmp.lt.u32.totalorder %s4186_s17, %s4588_s30 }
  0x92   : > { %p4194_p4 = por %p4193_p7, %p4192_p8 }
  0x93   : > { %p4190_p12 = pneg %p4189_p3 }
  0x94   : > { %p4196_p5 = por %p4195_p10, %p4194_p4 }
  0x96   : > { %p4197_p6 = pnand %p4196_p5, %p4190_p12 }
  0x98   : > { %4200 = shalt.err (!%p4197_p6)
}
  0x99   : > { %s4201_s29 = scalar_lea.vmem %s4672_s23, 16  ;;  %s4412_s27 = smov [#allocation8]  }
  0x9a   : > { %p4202_p1 = scmp.ne.s32.totalorder %s4672_s23, %s4201_s29  ;;  %s4206_s3 = sshll.u32 %s4412_s27, 4  ;;  %s4207_s3 = int_to_ptr.vmem [resolvable:$false] %s4206_s3 }
  0x9b   : > { %s4208_s5 = scalar_lea.vmem %s4207_s3, 32  ;;  %p4209_p13 = scmp.lt.s32.totalorder %s4672_s23, %s4207_s3 }
  0x9c   : > { %p4204_p9 = pnand %p4202_p1, %p5595_p0  ;;  %p4210_p2 = scmp.lt.s32.totalorder %s4208_s5, %s4201_s29 }
  0x9e   : > { %p4205_p11 = pneg %p4204_p9  ;;  %p4211_p3 = por %p4210_p2, %p4209_p13 }
  0xa0   : > { %p4212_p8 = pnand %p4211_p3, %p4205_p11 }
  0xa2   : > { %4215 = shalt.err (!%p4212_p8)
}
  0xa3   : > { %p5596_p12 = scmp.ne.s32.totalorder %s5585_s22, 0  ;;  %s5597_s10 = scalar_lea.sflag [#allocation7], %s4513_s14 }
  0xa4   : > { %s375_s25 = scalar_lea.vmem [#allocation11], %s4525_s18  ;;  %s3397_s13 = sshll.u32 %s4516_s15, 5 }
  0xa5   : > { %3849 = dma.hbm_to_vmem [thread:$0]  (!%p5596_p12), %s4588_s30, 16, %s4672_s23, %s5597_s10  }
  0xa6   : > { %s382_s17 = sshll.u32 %s375_s25, 4  ;;  %s4216_s1 = scalar_lea.hbm %s4678_s8, 256  ;;  %s4721_s17 = int_to_ptr.vmem [resolvable:$true] %s382_s17 }
  0xa7   : > { %p4217_p7 = scmp.ne.s32.totalorder %s4678_s8, %s4216_s1  ;;  %s4221_s16 = scalar_lea.hbm %s5552_s4, 512 }
  0xa8   : > { %p4222_p5 = scmp.lt.u32.totalorder %s4678_s8, %s5552_s4  ;;  %p4223_p6 = scmp.lt.u32.totalorder %s4221_s16, %s4216_s1 }
  0xa9   : > { %p4219_p4 = pnand %p4217_p7, %p5595_p0  ;;  %p4225_p9 = scmp.lt.u32.totalorder %s4216_s1, %s4678_s8 }
  0xaa   : > { %p4224_p1 = por %p4223_p6, %p4222_p5 }
  0xab   : > { %p4220_p10 = pneg %p4219_p4 }
  0xac   : > { %p4226_p11 = por %p4225_p9, %p4224_p1 }
  0xae   : > { %p4227_p13 = pnand %p4226_p11, %p4220_p10 }
  0xb0   : > { %4230 = shalt.err (!%p4227_p13)
}
  0xb1   : > { %s4231_s30 = scalar_lea.vmem %s4721_s17, 256  ;;  %s4413_s18 = smov [#allocation11]  }
  0xb2   : > { %p4232_p2 = scmp.ne.s32.totalorder %s4721_s17, %s4231_s30  ;;  %s4236_s23 = sshll.u32 %s4413_s18, 4  ;;  %s4237_s23 = int_to_ptr.vmem [resolvable:$false] %s4236_s23 }
  0xb3   : > { %s4238_s3 = scalar_lea.vmem %s4237_s23, 512  ;;  %p4239_p7 = scmp.lt.s32.totalorder %s4721_s17, %s4237_s23 }
  0xb4   : > { %p4234_p3 = pnand %p4232_p2, %p5595_p0  ;;  %p4240_p4 = scmp.lt.s32.totalorder %s4238_s3, %s4231_s30 }
  0xb6   : > { %p4235_p8 = pneg %p4234_p3  ;;  %p4241_p5 = por %p4240_p4, %p4239_p7 }
  0xb8   : > { %p4242_p6 = pnand %p4241_p5, %p4235_p8 }
  0xba   : > { %4245 = shalt.err (!%p4242_p6)
}
  0xbb   : > { %s5598_s5 = smov 4   ;;  %s5599_s10 = scalar_lea.sflag [#allocation10], %s4513_s14 }
  0xbc   : > { %3855 = dma.hbm_to_vmem [thread:$0]  (!%p5596_p12), %s4678_s8, 256, %s4721_s17, %s5599_s10, %s5589_s24, %s5589_s24, %s5598_s5  }
  0xbd   : > { %s3478_s25 = sshll.u32 %s4398_s9, 9  ;;  %s413_s1 = scalar_lea.vmem [#allocation14], %s3397_s13 }
  0xbe   : > { %s420_s11 = sshll.u32 %s413_s1, 4  ;;  %s4755_s29 = scalar_lea.hbm %s5554_s6, %s3478_s25  ;;  %s4757_s11 = int_to_ptr.vmem [resolvable:$true] %s420_s11 }
  0xbf   : > { %s4246_s27 = scalar_lea.hbm %s4755_s29, 512  ;;  %s4251_s13 = scalar_lea.hbm %s5554_s6, 1024 }
  0xc0   : > { %p4247_p10 = scmp.ne.s32.totalorder %s4755_s29, %s4246_s27  ;;  %p4252_p11 = scmp.lt.u32.totalorder %s4755_s29, %s5554_s6 }
  0xc1   : > { %p4253_p13 = scmp.lt.u32.totalorder %s4251_s13, %s4246_s27  ;;  %p4255_p3 = scmp.lt.u32.totalorder %s4246_s27, %s4755_s29 }
  0xc2   : > { %p4249_p1 = pnand %p4247_p10, %p5595_p0 }
  0xc3   : > { %p4254_p2 = por %p4253_p13, %p4252_p11 }
  0xc4   : > { %p4250_p9 = pneg %p4249_p1 }
  0xc5   : > { %p4256_p8 = por %p4255_p3, %p4254_p2 }
  0xc7   : > { %p4257_p7 = pnand %p4256_p8, %p4250_p9 }
  0xc9   : > { %4260 = shalt.err (!%p4257_p7)
}
  0xca   : > { %s4261_s23 = scalar_lea.vmem %s4757_s11, 512  ;;  %s4414_s3 = smov [#allocation14]  }
  0xcb   : > { %p4262_p4 = scmp.ne.s32.totalorder %s4757_s11, %s4261_s23  ;;  %s4266_s10 = sshll.u32 %s4414_s3, 4  ;;  %s4267_s10 = int_to_ptr.vmem [resolvable:$false] %s4266_s10 }
  0xcc   : > { %s4268_s25 = scalar_lea.vmem %s4267_s10, 1024  ;;  %p4269_p10 = scmp.lt.s32.totalorder %s4757_s11, %s4267_s10 }
  0xcd   : > { %p4264_p5 = pnand %p4262_p4, %p5595_p0  ;;  %p4270_p1 = scmp.lt.s32.totalorder %s4268_s25, %s4261_s23 }
  0xcf   : > { %p4265_p6 = pneg %p4264_p5  ;;  %p4271_p11 = por %p4270_p1, %p4269_p10 }
  0xd1   : > { %p4272_p13 = pnand %p4271_p11, %p4265_p6 }
  0xd3   : > { %4275 = shalt.err (!%p4272_p13)
}
  0xd4   : > { %s5600_s1 = scalar_lea.sflag [#allocation13], %s4513_s14  ;;  %s3400_s19 = sshll.u32 %s4516_s15, 3 }
  0xd5   : > { %3861 = dma.hbm_to_vmem [thread:$0]  (!%p5596_p12), %s4755_s29, 512, %s4757_s11, %s5600_s1, %s5589_s24, %s5589_s24, %s5598_s5  }
  0xd6   : > { %s3401_s16 = sshll.u32 %s4398_s9, 7  ;;  %s434_s13 = scalar_lea.vmem [#allocation15], %s3400_s19 }
  0xd7   : > { %s4790_s17 = scalar_lea.hbm %s5555_s7, %s3401_s16  ;;  %s441_s14 = sshll.u32 %s434_s13, 4  ;;  %s442_s14 = int_to_ptr.vmem [resolvable:$true] %s441_s14 }
  0xd8   : > { %s431_s30 = scalar_lea.sflag [#allocation16], %s4516_s15  ;;  %s4276_s18 = scalar_lea.hbm %s4790_s17, 128 }
  0xd9   : > { %p4277_p9 = scmp.ne.s32.totalorder %s4790_s17, %s4276_s18  ;;  %s4281_s11 = scalar_lea.hbm %s5555_s7, 256 }
  0xda   : > { %p4282_p8 = scmp.lt.u32.totalorder %s4790_s17, %s5555_s7  ;;  %p4283_p7 = scmp.lt.u32.totalorder %s4281_s11, %s4276_s18 }
  0xdb   : > { %p4279_p2 = pnand %p4277_p9, %p5595_p0  ;;  %p4285_p5 = scmp.lt.u32.totalorder %s4276_s18, %s4790_s17 }
  0xdc   : > { %p4284_p4 = por %p4283_p7, %p4282_p8 }
  0xdd   : > { %p4280_p3 = pneg %p4279_p2 }
  0xde   : > { %p4286_p6 = por %p4285_p5, %p4284_p4 }
  0xe0   : > { %p4287_p10 = pnand %p4286_p6, %p4280_p3 }
  0xe2   : > { %4290 = shalt.err (!%p4287_p10)
}
  0xe3   : > { %s4291_s15 = scalar_lea.vmem %s442_s14, 128  ;;  %s4415_s3 = smov [#allocation15]  }
  0xe4   : > { %p4292_p1 = scmp.ne.s32.totalorder %s442_s14, %s4291_s15  ;;  %s4296_s10 = sshll.u32 %s4415_s3, 4  ;;  %s4297_s10 = int_to_ptr.vmem [resolvable:$false] %s4296_s10 }
  0xe5   : > { %s4298_s25 = scalar_lea.vmem %s4297_s10, 256  ;;  %p4299_p9 = scmp.lt.s32.totalorder %s442_s14, %s4297_s10 }
  0xe6   : > { %p4294_p11 = pnand %p4292_p1, %p5595_p0  ;;  %p4300_p2 = scmp.lt.s32.totalorder %s4298_s25, %s4291_s15 }
  0xe8   : > { %p4295_p13 = pneg %p4294_p11  ;;  %p4301_p12 = por %p4300_p2, %p4299_p9 }
  0xea   : > { %p4302_p7 = pnand %p4301_p12, %p4295_p13 }
  0xec   : > { %4305 = shalt.err (!%p4302_p7)
}
  0xed   : > { %p5601_p8 = scmp.ne.s32.totalorder %s5585_s22, 0  ;;  %p5602_p3 = scmp.ne.s32.totalorder %s5593_s26, 0 }
  0xee   : > { %p5603_p4 = scmp.eq.s32.totalorder (!%p5602_p3), %s4646_s21, 0 }
  0xef   : > { %3864 = dma.hbm_to_vmem [thread:$0]  (!%p5601_p8), %s4790_s17, 128, %s442_s14, %s431_s30  }
  0xf0   : > { %450 = sbr.rel (%p5602_p3) target bundleno = 3542 (0xdd6), region = 52 }
  0xf7   : > { %4357 = dma.done.wait (%p5603_p4), [#allocation4], 1024   ;;  %p5604_p0 = pmov %p5603_p4 }
  0xf8   : > { %s456_s12 = sand.u32 1, %s4646_s21   ;;  %s4818_s1 = sand.u32 1, %s4386_s28  }
  0xf9   : > { %4359 = vsyncadd (%p5604_p0), [#allocation4], 4294966272  ;;  %s4821_s19 = sshll.u32 %s4818_s1, 4  ;;  %s457_s22 = scalar_lea.sflag [#allocation7], %s456_s12 }
  0xfa   : > { %s460_s16 = scalar_lea.vmem [#allocation6], %s4821_s19  ;;  %p5605_p12 = scmp.ne.s32.totalorder %s5592_s20, 0 }
  0xfc   : > { %4361 = dma.done.wait (%p5605_p12), %s457_s22, 272  }
  0xfd   : > { %4363 = vsyncadd (%p5605_p12), %s457_s22, 4294967024  ;;  %s468_s26 = scalar_lea.vmem [#allocation8], %s4818_s1  ;;  %s474_s27 = scalar_lea.sflag [#allocation10], %s456_s12 }
  0xfe   : > { %s477_s8 = scalar_lea.vmem [#allocation9], %s4821_s19 }
  0xff   : > { %4365 = dma.done.wait (%p5605_p12), %s474_s27, 512  }
 0x100   : > { %4367 = vsyncadd (%p5605_p12), %s474_s27, 4294966784  ;;  %s486_s17 = scalar_lea.vmem [#allocation11], %s4821_s19  ;;  %s492_s13 = scalar_lea.sflag [#allocation13], %s456_s12 }
 0x101   : > { %s494_s14 = scalar_lea.vmem [#allocation12], %s4818_s1 }
 0x102   : > { %4369 = dma.done.wait (%p5605_p12), %s492_s13, 528  }
 0x103   : > { %4371 = vsyncadd (%p5605_p12), %s492_s13, 4294966768  ;;  %s3407_s30 = sshll.u32 %s4818_s1, 5  ;;  %s3408_s18 = sshll.u32 %s4818_s1, 3 }
 0x104   : > { %s4842_s24 = scalar_lea.vmem [#allocation14], %s3407_s30  ;;  %s509_s5 = scalar_lea.sflag [#allocation16], %s4818_s1 }
 0x105   : > { %s4845_s11 = scalar_lea.vmem [#allocation15], %s3408_s18 }
 0x106   : > { %4373 = dma.done.wait (%p5605_p12), %s509_s5, 128  }
 0x107   : > { %4375 = vsyncadd (%p5605_p12), %s509_s5, 4294967168  ;;  %s5606_s29 = sld [smem:[#allocation25_spill]] }
 0x10d   : > { %p3409_p5 = scmp.ne.s32.totalorder %s5606_s29, 0 }
 0x10e   : > { %v575_v0 = vld [vmem:[#allocation3] sm:$0xff] (!%p3409_p5)  ;;  %vm583_vm0 = vcmask (!%p3409_p5), 261120   ;;  %v576_v1 = vld [vmem:[#allocation3 + $0x8] sm:$0xff] (!%p3409_p5)  ;;  %v577_v2 = vld [vmem:[#allocation3 + $0x10] sm:$0xff] (!%p3409_p5) }
 0x10f   : > { %574 = sbr.rel (%p3409_p5) target bundleno = 278 (0x116), region = 88  ;;  %584 = vst.msk [vmem:[#allocation2] sm:$0xff] (!%p3409_p5), %vm583_vm0, %v575_v0  ;;  %585 = vst.msk [vmem:[#allocation2 + $0x8] sm:$0xff] (!%p3409_p5), %vm583_vm0, %v576_v1  ;;  %v578_v3 = vld [vmem:[#allocation3 + $0x18] sm:$0xff] (!%p3409_p5)  ;;  %v579_v4 = vld [vmem:[#allocation3 + $0x20] sm:$0xff] (!%p3409_p5) }
 0x110   : > { %586 = vst.msk [vmem:[#allocation2 + $0x10] sm:$0xff] (!%p3409_p5), %vm583_vm0, %v577_v2  ;;  %v580_v5 = vld [vmem:[#allocation3 + $0x28] sm:$0xff] (!%p3409_p5)  ;;  %587 = vst.msk [vmem:[#allocation2 + $0x18] sm:$0xff] (!%p3409_p5), %vm583_vm0, %v578_v3  ;;  %v581_v6 = vld [vmem:[#allocation3 + $0x30] sm:$0xff] (!%p3409_p5) }
 0x111   : > { %588 = vst.msk [vmem:[#allocation2 + $0x20] sm:$0xff] (!%p3409_p5), %vm583_vm0, %v579_v4  ;;  %589 = vst.msk [vmem:[#allocation2 + $0x28] sm:$0xff] (!%p3409_p5), %vm583_vm0, %v580_v5  ;;  %v582_v7 = vld [vmem:[#allocation3 + $0x38] sm:$0xff] (!%p3409_p5) }
 0x112   : > { %590 = vst.msk [vmem:[#allocation2 + $0x30] sm:$0xff] (!%p3409_p5), %vm583_vm0, %v581_v6  ;;  %591 = vst.msk [vmem:[#allocation2 + $0x38] sm:$0xff] (!%p3409_p5), %vm583_vm0, %v582_v7 }
 0x116 PF: > { %v3954_v8 = vld [vmem:[%s460_s16] sm:$0xff]   ;;  %v3955_v9 = vld [vmem:[%s460_s16 + $0x8] sm:$0xff]   ;;  %vm628_vm1 = vcmask 261120   ;;  %v4416_v22 = vmov 0.0   ;;  %vm4417_vm2 = vmmov 0   ;;  %s4418_s20 = smov 96   ;;  %v706_v0 = vlaneseq }
 0x117   : > { %3569 = vmatprep.subr.bf16.mxu0 %v3954_v8  ;;  %v592_v10 = vld [vmem:[#allocation2] sm:$0xff]  ;;  %v593_v11 = vld [vmem:[#allocation2 + $0x8] sm:$0xff]  ;;  %3813 = vmatprep.subr.bf16.mxu1 %v3954_v8  ;;  %v594_v12 = vld [vmem:[#allocation2 + $0x10] sm:$0xff]  ;;  %vm722_vm3 = vcmask 130048   ;;  %vm1130_vm5 = vcmask 64512   ;;  %s4419_s23 = smov 64  }
 0x118   : > { %3570 = vmatpush3.bf16.msra.mxu0 %v3954_v8  ;;  %v600_v13 = vpack.c.bf16 %v593_v11, %v592_v10  ;;  %v595_v14 = vld [vmem:[#allocation2 + $0x18] sm:$0xff]  ;;  %3815 = vmatpush3.bf16.msra.mxu1 %v3954_v8  ;;  %v596_v15 = vld [vmem:[#allocation2 + $0x20] sm:$0xff]  ;;  %v597_v16 = vld [vmem:[#allocation2 + $0x28] sm:$0xff]  ;;  %v4940_v1 = vshrl.u32 %v706_v0, 7  ;;  %v709_v2 = vand.u32 127, %v706_v0  ;;  %vm1232_vm6 = vcmask 1043456  }
 0x119   : > { %3571 = vmatprep.subr.bf16.mxu0 %v3955_v9  ;;  %3814 = vmatprep.subr.bf16.mxu1 %v3955_v9  ;;  %v602_v17 = vpack.c.bf16 %v597_v16, %v596_v15  ;;  %v598_v18 = vld [vmem:[#allocation2 + $0x30] sm:$0xff]  ;;  %v599_v19 = vld [vmem:[#allocation2 + $0x38] sm:$0xff]  ;;  %v601_v20 = vpack.c.bf16 %v595_v14, %v594_v12  ;;  %v3410_v23 = vld [vmem:[%s468_s26] ss:$0 sm:$0xff]  ;;  %s4420_s15 = smov 80   ;;  %s4421_s3 = smov 112  }
 0x11a   : > { %3573 = vmatprep.mubr.msk.bf16.mxu0 %vm628_vm1, %v600_v13  ;;  %v603_v21 = vpack.c.bf16 %v599_v19, %v598_v18  ;;  %vm4943_vm4 = vcmp.ge.s32.totalorder %v4940_v1, %v709_v2  ;;  %s4422_s10 = smov 48   ;;  %s4423_s25 = smov 16   ;;  %vm2938_vm7 = vcmask 523264  }
 0x11b   : > { %3577 = vmatprep.mubr.msk.bf16.mxu1 %vm628_vm1, %v602_v17  ;;  %s5609_s12 = sld [smem:[#allocation25_spill]] }
 0x11c   : > { %3572 = vmatpush3.bf16.msra.mxu0 %v3955_v9  ;;  %3816 = vmatpush3.bf16.msra.mxu1 %v3955_v9 }
 0x11d   : > { %3593 = vmatprep.subr.bf16.mxu0 %v4416_v22  ;;  %3581 = vmatprep.subr.bf16.mxu1 %v4416_v22 }
 0x11f   : > { %3574 = vmatmul.mubr.msk.bf16.vlgmr.msra.gmra.mrb[0].mxu0 %vm628_vm1, %v601_v20  ;;  %3578 = vmatmul.mubr.msk.bf16.vlgmr.msra.gmra.mrb[0].mxu1 %vm628_vm1, %v603_v21 }
 0x120   : > { %3595 = vmatprep.mubr.msk.bf16.mxu0 %vm4417_vm2, %v4416_v22  ;;  %3583 = vmatprep.mubr.msk.bf16.mxu1 %vm4417_vm2, %v4416_v22 }
 0x121   : > { %p3470_p6 = scmp.ne.s32.totalorder %s5609_s12, 1 }
 0x1f2   : > { %v3575_v24 = vpop.f32.mrb[0].mxu0  ;;  %v3579_v25 = vpop.f32.mrb[0].mxu1 }
 0x1f3   : > { %v684_v26 = vadd.f32 %v3575_v24, %v3410_v23  ;;  %v675_v27 = vpop.f32.mrb[1].mxu0  ;;  %v691_v28 = vpop.f32.mrb[1].mxu1  ;;  %v700_v44 = vadd.f32 %v3579_v25, %v3410_v23 }
 0x1f4   : > { %v676_v29 = vadd.f32 %v3410_v23, %v675_v27  ;;  %v3576_v30 = vpop.f32.mrb[2].mxu0  ;;  %v3580_v31 = vpop.f32.mrb[2].mxu1  ;;  %v692_v39 = vadd.f32 %v3410_v23, %v691_v28 }
 0x1f5   : > { %v4868_v32 = vpack.c.bf16 %v684_v26, %v684_v26  ;;  %v687_v33 = vadd.f32 %v3576_v30, %v3410_v23  ;;  %v678_v34 = vpop.f32.mrb[3].mxu0  ;;  %v694_v35 = vpop.f32.mrb[3].mxu1  ;;  %v703_v42 = vadd.f32 %v3580_v31, %v3410_v23  ;;  %v4887_v47 = vpack.c.bf16 %v700_v44, %v700_v44 }
 0x1f6   : > { %v4870_v36 = vpack.c.bf16 %v676_v29, %v676_v29  ;;  %v679_v37 = vadd.f32 %v3410_v23, %v678_v34  ;;  %v695_v38 = vadd.f32 %v3410_v23, %v694_v35  ;;  %v4881_v45 = vpack.c.bf16 %v692_v39, %v692_v39 }
 0x1f7   : > { %819 = vrot.lane.b32.xlu1 %v4868_v32, %s4418_s20  ;;  %v4874_v40 = vpack.c.bf16 %v687_v33, %v687_v33  ;;  %v4884_v46 = vpack.c.bf16 %v703_v42, %v703_v42 }
 0x1f8   : > { %720 = vrot.lane.b32.xlu0 %v4870_v36, %s4418_s20  ;;  %v4876_v41 = vpack.c.bf16 %v679_v37, %v679_v37  ;;  %v4879_v43 = vpack.c.bf16 %v695_v38, %v695_v38 }
 0x1fb   : > { %868 = vrot.lane.b32.xlu1 %v4874_v40, %s4418_s20 }
 0x1fc   : > { %770 = vrot.lane.b32.xlu0 %v4876_v41, %s4418_s20 }
 0x1ff   : > { %966 = vrot.lane.b32.xlu1 %v4879_v43, %s4418_s20 }
 0x200   : > { %917 = vrot.lane.b32.xlu0 %v4881_v45, %s4418_s20 }
 0x203   : > { %1064 = vrot.lane.b32.xlu1 %v4884_v46, %s4418_s20 }
 0x204   : > { %1015 = vrot.lane.b32.xlu0 %v4887_v47, %s4418_s20 }
 0x269   : > { %v820_v48 = vpop.permute.xlu1 %819 }
 0x26a   : > { %v825_v49 = vsel %vm722_vm3, %v820_v48, 0  ;;  %v721_v50 = vpop.permute.xlu0 %720 }
 0x26b   : > { %v727_v51 = vsel %vm722_vm3, %v721_v50, 0  ;;  %3594 = vmatpush3.bf16.xpose.msra.mxu0 %v825_v49 }
 0x26c   : > { %3582 = vmatpush3.bf16.xpose.msra.mxu1 %v727_v51  ;;  %3605 = vmatprep.subr.bf16.mxu0 %v4416_v22 }
 0x26d   : > { %3587 = vmatprep.subr.bf16.mxu1 %v4416_v22  ;;  %v869_v57 = vpop.permute.xlu1 %868 }
 0x26e   : > { %v771_v52 = vpop.permute.xlu0 %770  ;;  %v874_v59 = vsel %vm722_vm3, %v869_v57, 0 }
 0x26f   : > { %v776_v54 = vsel %vm722_vm3, %v771_v52, 0 }
 0x271   : > { %v967_v60 = vpop.permute.xlu1 %966 }
 0x272   : > { %3596 = vmatmul.mubr.msk.bf16.vlgmr.msra.gmra.mrb[4].mxu0 %vm722_vm3, %v4868_v32  ;;  %v918_v53 = vpop.permute.xlu0 %917  ;;  %v972_v61 = vsel %vm722_vm3, %v967_v60, 0 }
 0x273   : > { %v923_v55 = vsel %vm722_vm3, %v918_v53, 0  ;;  %3584 = vmatmul.mubr.msk.bf16.vlgmr.msra.gmra.mrb[4].mxu1 %vm722_vm3, %v4870_v36  ;;  %3607 = vmatprep.mubr.msk.bf16.mxu0 %vm4417_vm2, %v4416_v22 }
 0x274   : > { %3588 = vmatpush3.bf16.xpose.msra.mxu1 %v776_v54  ;;  %3606 = vmatpush3.bf16.xpose.msra.mxu0 %v923_v55 }
 0x275   : > { %3589 = vmatprep.mubr.msk.bf16.mxu1 %vm4417_vm2, %v4416_v22  ;;  %3599 = vmatprep.subr.bf16.mxu1 %v4416_v22  ;;  %v1065_v62 = vpop.permute.xlu1 %1064 }
 0x276   : > { %v1016_v56 = vpop.permute.xlu0 %1015  ;;  %3617 = vmatprep.subr.bf16.mxu0 %v4416_v22  ;;  %v1070_v63 = vsel %vm722_vm3, %v1065_v62, 0 }
 0x277   : > { %v1021_v58 = vsel %vm722_vm3, %v1016_v56, 0 }
 0x27b   : > { %3590 = vmatmul.mubr.msk.bf16.vlgmr.msra.gmra.mrb[8].mxu1 %vm722_vm3, %v4876_v41  ;;  %3608 = vmatmul.mubr.msk.bf16.vlgmr.msra.gmra.mrb[8].mxu0 %vm722_vm3, %v4881_v45 }
 0x27c   : > { %3600 = vmatpush3.bf16.xpose.msra.mxu1 %v874_v59  ;;  %3618 = vmatpush3.bf16.xpose.msra.mxu0 %v1021_v58 }
 0x27d   : > { %3601 = vmatprep.mubr.msk.bf16.mxu1 %vm4417_vm2, %v4416_v22  ;;  %3619 = vmatprep.mubr.msk.bf16.mxu0 %vm4417_vm2, %v4416_v22 }
 0x27e   : > { %3611 = vmatprep.subr.bf16.mxu1 %v4416_v22  ;;  %3629 = vmatprep.subr.bf16.mxu0 %v4416_v22 }
 0x283   : > { %3602 = vmatmul.mubr.msk.bf16.vlgmr.msra.gmra.mrb[12].mxu1 %vm722_vm3, %v4874_v40  ;;  %3620 = vmatmul.mubr.msk.bf16.vlgmr.msra.gmra.mrb[12].mxu0 %vm722_vm3, %v4887_v47 }
 0x284   : > { %3612 = vmatpush3.bf16.xpose.msra.mxu1 %v972_v61  ;;  %3613 = vmatprep.mubr.msk.bf16.mxu1 %vm4417_vm2, %v4416_v22 }
 0x285   : > { %3623 = vmatprep.subr.bf16.mxu1 %v4416_v22  ;;  %3631 = vmatprep.mubr.msk.bf16.mxu0 %vm4417_vm2, %v4416_v22 }
 0x28b   : > { %3614 = vmatmul.mubr.msk.bf16.vlgmr.msra.gmra.mrb[16].mxu1 %vm722_vm3, %v4879_v43 }
 0x28c   : > { %3624 = vmatpush3.bf16.xpose.msra.mxu1 %v1070_v63  ;;  %3625 = vmatprep.mubr.msk.bf16.mxu1 %vm4417_vm2, %v4416_v22 }
 0x28d   : > { %3635 = vmatprep.subr.bf16.mxu1 %v4416_v22 }
 0x293   : > { %3626 = vmatmul.mubr.msk.bf16.vlgmr.msra.gmra.mrb[20].mxu1 %vm722_vm3, %v4884_v46 }
 0x294   : > { %3637 = vmatprep.mubr.msk.bf16.mxu1 %vm4417_vm2, %v4416_v22 }
 0x345   : > { %v861_v3 = vpop.f32.mrb[4].mxu0 }
 0x346   : > { %v1114_v5 = vmul.f32 0.25, %v861_v3  ;;  %v763_v6 = vpop.f32.mrb[4].mxu1  ;;  %v3597_v7 = vpop.f32.mrb[5].mxu0 }
 0x347   : > { %v1112_v8 = vmul.f32 0.25, %v763_v6  ;;  %v3585_v9 = vpop.f32.mrb[5].mxu1  ;;  %v864_v10 = vpop.f32.mrb[6].mxu0 }
 0x348   : > { %v766_v11 = vpop.f32.mrb[6].mxu1  ;;  %v3598_v12 = vpop.f32.mrb[7].mxu0  ;;  %v4949_v13 = vsel %vm4943_vm4, %v1114_v5, -1e+30 }
 0x349   : > { %v3586_v14 = vpop.f32.mrb[7].mxu1  ;;  %v1137_v15 = vsel %vm1130_vm5, %v4949_v13, -inf  ;;  %v4955_v16 = vsel %vm4943_vm4, %v1112_v8, -1e+30 }
 0x34a   : > { %1138 = vmax.xlane.f32.xlu0 %v1137_v15  ;;  %v1131_v17 = vsel %vm1130_vm5, %v4955_v16, -inf }
 0x34e   : > { %1132 = vmax.xlane.f32.xlu0 %v1131_v17  ;;  %v812_v18 = vpop.f32.mrb[8].mxu1  ;;  %v959_v19 = vpop.f32.mrb[8].mxu0 }
 0x34f   : > { %v1113_v20 = vmul.f32 0.25, %v812_v18  ;;  %v1116_v21 = vmul.f32 0.25, %v959_v19  ;;  %v3591_v23 = vpop.f32.mrb[9].mxu1  ;;  %v3609_v24 = vpop.f32.mrb[9].mxu0 }
 0x350   : > { %v815_v25 = vpop.f32.mrb[10].mxu1  ;;  %v962_v26 = vpop.f32.mrb[10].mxu0 }
 0x351   : > { %v3592_v27 = vpop.f32.mrb[11].mxu1  ;;  %v3610_v28 = vpop.f32.mrb[11].mxu0  ;;  %v1126_v29 = vsel %vm4943_vm4, %v1116_v21, -1e+30  ;;  %v1123_v31 = vsel %vm4943_vm4, %v1113_v20, -1e+30 }
 0x352   : > { %v1143_v30 = vsel %vm1130_vm5, %v1126_v29, -inf  ;;  %v1134_v35 = vsel %vm1130_vm5, %v1123_v31, -inf }
 0x353   : > { %1144 = vmax.xlane.f32.xlu1 %v1143_v30 }
 0x356   : > { %v910_v33 = vpop.f32.mrb[12].mxu1  ;;  %v1057_v34 = vpop.f32.mrb[12].mxu0 }
 0x357   : > { %v3603_v37 = vpop.f32.mrb[13].mxu1  ;;  %1135 = vmax.xlane.f32.xlu1 %v1134_v35  ;;  %v3621_v38 = vpop.f32.mrb[13].mxu0  ;;  %v1115_v57 = vmul.f32 0.25, %v910_v33  ;;  %v1118_v63 = vmul.f32 0.25, %v1057_v34 }
 0x358   : > { %v913_v39 = vpop.f32.mrb[14].mxu1  ;;  %v1060_v42 = vpop.f32.mrb[14].mxu0 }
 0x359   : > { %v3604_v44 = vpop.f32.mrb[15].mxu1  ;;  %v3622_v48 = vpop.f32.mrb[15].mxu0  ;;  %v1125_v59 = vsel %vm4943_vm4, %v1115_v57, -1e+30  ;;  %v1128_v3 = vsel %vm4943_vm4, %v1118_v63, -1e+30 }
 0x35a   : > { %v1140_v60 = vsel %vm1130_vm5, %v1125_v59, -inf  ;;  %v1149_v6 = vsel %vm1130_vm5, %v1128_v3, -inf }
 0x35e   : > { %v1008_v49 = vpop.f32.mrb[16].mxu1 }
 0x35f   : > { %v3615_v50 = vpop.f32.mrb[17].mxu1  ;;  %v1117_v58 = vmul.f32 0.25, %v1008_v49 }
 0x360   : > { %v1011_v51 = vpop.f32.mrb[18].mxu1 }
 0x361   : > { %v3616_v52 = vpop.f32.mrb[19].mxu1  ;;  %v1127_v62 = vsel %vm4943_vm4, %v1117_v58, -1e+30 }
 0x362   : > { %v1146_v0 = vsel %vm1130_vm5, %v1127_v62, -inf }
 0x364   : > { %1276 = vrot.lane.b32.xlu0 %v4876_v41, %s4419_s23 }
 0x366   : > { %v1106_v53 = vpop.f32.mrb[20].mxu1 }
 0x367   : > { %v3627_v54 = vpop.f32.mrb[21].mxu1  ;;  %v1119_v61 = vmul.f32 0.25, %v1106_v53 }
 0x368   : > { %v1109_v55 = vpop.f32.mrb[22].mxu1  ;;  %1227 = vrot.lane.b32.xlu1 %v4870_v36, %s4419_s23 }
 0x369   : > { %v3628_v56 = vpop.f32.mrb[23].mxu1  ;;  %v4977_v2 = vsel %vm4943_vm4, %v1119_v61, -1e+30 }
 0x36a   : > { %v1152_v5 = vsel %vm1130_vm5, %v4977_v2, -inf }
 0x383   : > { %1141 = vmax.xlane.f32.xlu0 %v1140_v60 }
 0x387   : > { %1147 = vmax.xlane.f32.xlu0 %v1146_v0 }
 0x38b   : > { %1153 = vmax.xlane.f32.xlu0 %v1152_v5 }
 0x38c   : > { %1150 = vmax.xlane.f32.xlu1 %v1149_v6 }
 0x39d   : > { %1324 = vrot.lane.b32.xlu1 %v4868_v32, %s4419_s23 }
 0x3a1   : > { %1420 = vrot.lane.b32.xlu0 %v4881_v45, %s4419_s23  ;;  %1372 = vrot.lane.b32.xlu1 %v4874_v40, %s4419_s23 }
 0x3a5   : > { %1468 = vrot.lane.b32.xlu1 %v4879_v43, %s4419_s23 }
 0x3d7   : > { %v1139_v7 = vpop.xlane.xlu0 %1138 }
 0x3d8   : > { %v1157_v8 = vsub.f32 %v4949_v13, %v1139_v7 }
 0x3da   : > { %v1167_v9 = vmul.f32 1.442695, %v1157_v8 }
 0x3db   : > { %v1133_v10 = vpop.xlane.xlu0 %1132 }
 0x3dc   : > { %3964 = vpow2.f32 %v1167_v9  ;;  %v1155_v11 = vsub.f32 %v4955_v16, %v1133_v10 }
 0x3de   : > { %v1163_v12 = vmul.f32 1.442695, %v1155_v11 }
 0x3df   : > { %v1277_v14 = vpop.permute.xlu0 %1276 }
 0x3e0   : > { %3966 = vpow2.f32 %v1163_v12  ;;  %v1282_v15 = vsel %vm1232_vm6, %v1277_v14, 0  ;;  %v1145_v17 = vpop.xlane.xlu1 %1144 }
 0x3e1   : > { %v1159_v18 = vsub.f32 %v1126_v29, %v1145_v17  ;;  %3636 = vmatpush3.bf16.msra.mxu1 %v1282_v15 }
 0x3e2   : > { %3647 = vmatprep.subr.bf16.mxu1 %v4416_v22 }
 0x3e3   : > { %v1171_v19 = vmul.f32 1.442695, %v1159_v18 }
 0x3e4   : > { %v1136_v20 = vpop.xlane.xlu1 %1135 }
 0x3e5   : > { %3968 = vpow2.f32 %v1171_v19  ;;  %v1156_v13 = vsub.f32 %v1123_v31, %v1136_v20 }
 0x3e6   : > { %v4996_v21 = vpop.eup %3964 }
 0x3e7   : > { %v1165_v23 = vmul.f32 1.442695, %v1156_v13  ;;  %v1185_v16 = vsel %vm1130_vm5, %v4996_v21, 0.0 }
 0x3e8   : > { %v1228_v24 = vpop.permute.xlu1 %1227  ;;  %1186 = vadd.xlane.f32.xlu1 %v1185_v16 }
 0x3e9   : > { %3970 = vpow2.f32 %v1165_v23  ;;  %v1234_v25 = vsel %vm1232_vm6, %v1228_v24, 0 }
 0x3ea   : > { %v5001_v26 = vpop.eup %3966  ;;  %3630 = vmatpush3.bf16.msra.mxu0 %v1234_v25 }
 0x3eb   : > { %v1179_v27 = vsel %vm1130_vm5, %v5001_v26, 0.0  ;;  %3641 = vmatprep.subr.bf16.mxu0 %v4416_v22 }
 0x3ec   : > { %1180 = vadd.xlane.f32.xlu1 %v1179_v27 }
 0x3ef   : > { %v5006_v28 = vpop.eup %3968 }
 0x3f0   : > { %v1191_v29 = vsel %vm1130_vm5, %v5006_v28, 0.0 }
 0x3f1   : > { %1192 = vadd.xlane.f32.xlu1 %v1191_v29 }
 0x3f3   : > { %v5010_v30 = vpop.eup %3970 }
 0x3f4   : > { %v1182_v31 = vsel %vm1130_vm5, %v5010_v30, 0.0 }
 0x3f5   : > { %1183 = vadd.xlane.f32.xlu0 %v1182_v31 }
 0x410   : > { %v1142_v33 = vpop.xlane.xlu0 %1141 }
 0x411   : > { %v1158_v34 = vsub.f32 %v1125_v59, %v1142_v33 }
 0x413   : > { %v1169_v35 = vmul.f32 1.442695, %v1158_v34 }
 0x414   : > { %v1148_v37 = vpop.xlane.xlu0 %1147 }
 0x415   : > { %3972 = vpow2.f32 %v1169_v35  ;;  %v1160_v38 = vsub.f32 %v1127_v62, %v1148_v37 }
 0x417   : > { %v1173_v39 = vmul.f32 1.442695, %v1160_v38 }
 0x418   : > { %v1154_v55 = vpop.xlane.xlu0 %1153 }
 0x419   : > { %3974 = vpow2.f32 %v1173_v39  ;;  %v1151_v42 = vpop.xlane.xlu1 %1150  ;;  %v1162_v56 = vsub.f32 %v4977_v2, %v1154_v55 }
 0x41a   : > { %v1161_v44 = vsub.f32 %v1128_v3, %v1151_v42 }
 0x41b   : > { %v1177_v57 = vmul.f32 1.442695, %v1162_v56 }
 0x41c   : > { %v1175_v48 = vmul.f32 1.442695, %v1161_v44  ;;  %v1421_v2 = vpop.permute.xlu0 %1420 }
 0x41d   : > { %v1325_v60 = vpop.permute.xlu1 %1324  ;;  %v1426_v18 = vsel %vm1232_vm6, %v1421_v2, 0 }
 0x41e   : > { %3976 = vpow2.f32 %v1175_v48  ;;  %v1330_v9 = vsel %vm1232_vm6, %v1325_v60, 0 }
 0x41f   : > { %v5014_v49 = vpop.eup %3972  ;;  %3978 = vpow2.f32 %v1177_v57 }
 0x420   : > { %v1188_v50 = vsel %vm1130_vm5, %v5014_v49, 0.0 }
 0x421   : > { %1189 = vadd.xlane.f32.xlu0 %v1188_v50  ;;  %v1373_v61 = vpop.permute.xlu1 %1372 }
 0x422   : > { %v1378_v19 = vsel %vm1232_vm6, %v1373_v61, 0 }
 0x423   : > { %v5018_v51 = vpop.eup %3974 }
 0x424   : > { %v1194_v52 = vsel %vm1130_vm5, %v5018_v51, 0.0 }
 0x425   : > { %1195 = vadd.xlane.f32.xlu0 %v1194_v52  ;;  %v1469_v62 = vpop.permute.xlu1 %1468 }
 0x428   : > { %v5022_v53 = vpop.eup %3976 }
 0x429   : > { %v1197_v54 = vsel %vm1130_vm5, %v5022_v53, 0.0  ;;  %v5043_v58 = vpop.eup %3978 }
 0x42a   : > { %1198 = vadd.xlane.f32.xlu1 %v1197_v54  ;;  %v1200_v59 = vsel %vm1130_vm5, %v5043_v58, 0.0 }
 0x43b   : > { %1564 = vrot.lane.b32.xlu1 %v4884_v46, %s4419_s23  ;;  %1516 = vrot.lane.b32.xlu0 %v4887_v47, %s4419_s23 }
 0x43f   : > { %1664 = vrot.lane.b32.xlu1 %v4876_v41, %s4420_s15 }
 0x443   : > { %1662 = vrot.lane.b32.xlu1 %v4876_v41, %s4421_s3 }
 0x447   : > { %1764 = vrot.lane.b32.xlu1 %v4874_v40, %s4420_s15 }
 0x44b   : > { %1762 = vrot.lane.b32.xlu1 %v4874_v40, %s4421_s3 }
 0x44f   : > { %1864 = vrot.lane.b32.xlu1 %v4879_v43, %s4420_s15 }
 0x453   : > { %1862 = vrot.lane.b32.xlu1 %v4879_v43, %s4421_s3 }
 0x457   : > { %1964 = vrot.lane.b32.xlu1 %v4884_v46, %s4420_s15 }
 0x45a   : > { %1201 = vadd.xlane.f32.xlu0 %v1200_v59 }
 0x45b   : > { %1962 = vrot.lane.b32.xlu1 %v4884_v46, %s4421_s3 }
 0x45f   : > { %2124 = vrot.lane.b32.xlu1 %v4870_v36, %s4422_s10 }
 0x470   : > { %1614 = vrot.lane.b32.xlu0 %v4870_v36, %s4420_s15 }
 0x474   : > { %1612 = vrot.lane.b32.xlu0 %v4870_v36, %s4421_s3 }
 0x475   : > { %v1187_v63 = vpop.xlane.xlu1 %1186 }
 0x478   : > { %1714 = vrot.lane.b32.xlu0 %v4868_v32, %s4420_s15 }
 0x479   : > { %v1181_v0 = vpop.xlane.xlu1 %1180 }
 0x47a   : > { %3980 = vrcp.f32 %v1181_v0 }
 0x47b   : > { %3982 = vrcp.f32 %v1187_v63 }
 0x47c   : > { %1712 = vrot.lane.b32.xlu0 %v4868_v32, %s4421_s3 }
 0x47e   : > { %v1193_v5 = vpop.xlane.xlu1 %1192 }
 0x480   : > { %1814 = vrot.lane.b32.xlu0 %v4881_v45, %s4420_s15 }
 0x482   : > { %v1184_v3 = vpop.xlane.xlu0 %1183 }
 0x483   : > { %3984 = vrcp.f32 %v1184_v3 }
 0x484   : > { %v3981_v6 = vpop.eup %3980  ;;  %1812 = vrot.lane.b32.xlu0 %v4881_v45, %s4421_s3  ;;  %3986 = vrcp.f32 %v1193_v5 }
 0x485   : > { %v1211_v36 = vmul.f32 %v3981_v6, %v5001_v26  ;;  %v3983_v8 = vpop.eup %3982 }
 0x486   : > { %v1213_v10 = vmul.f32 %v3983_v8, %v4996_v21 }
 0x487   : > { %v1219_v7 = vpack.c.bf16 %v1211_v36, %v1211_v36 }
 0x488   : > { %1914 = vrot.lane.b32.xlu0 %v4887_v47, %s4420_s15  ;;  %v1221_v14 = vpack.c.bf16 %v1213_v10, %v1213_v10 }
 0x489   : > { %3632 = vmatmul.mubr.msk.bf16.vlgmr.msra.gmra.mrb[16].mxu0 %vm1130_vm5, %v1219_v7 }
 0x48a   : > { %3642 = vmatpush3.bf16.msra.mxu0 %v1330_v9  ;;  %3643 = vmatprep.mubr.msk.bf16.mxu0 %vm4417_vm2, %v4416_v22 }
 0x48b   : > { %3653 = vmatprep.subr.bf16.mxu0 %v4416_v22 }
 0x48c   : > { %1912 = vrot.lane.b32.xlu0 %v4887_v47, %s4421_s3 }
 0x48d   : > { %v3985_v11 = vpop.eup %3984 }
 0x48e   : > { %v1212_v12 = vmul.f32 %v3985_v11, %v5010_v30  ;;  %v3987_v15 = vpop.eup %3986  ;;  %v1474_v30 = vsel %vm1232_vm6, %v1469_v62, 0 }
 0x48f   : > { %v1215_v20 = vmul.f32 %v3987_v15, %v5006_v28 }
 0x490   : > { %v1220_v17 = vpack.c.bf16 %v1212_v12, %v1212_v12 }
 0x491   : > { %3644 = vmatmul.mubr.msk.bf16.vlgmr.msra.gmra.mrb[20].mxu0 %vm1130_vm5, %v1221_v14  ;;  %v1223_v13 = vpack.c.bf16 %v1215_v20, %v1215_v20 }
 0x492   : > { %3654 = vmatpush3.bf16.msra.mxu0 %v1426_v18  ;;  %3638 = vmatmul.mubr.msk.bf16.vlgmr.msra.gmra.mrb[24].mxu1 %vm1130_vm5, %v1220_v17 }
 0x493   : > { %3648 = vmatpush3.bf16.msra.mxu1 %v1378_v19  ;;  %3655 = vmatprep.mubr.msk.bf16.mxu0 %vm4417_vm2, %v4416_v22 }
 0x494   : > { %3665 = vmatprep.subr.bf16.mxu0 %v4416_v22  ;;  %3649 = vmatprep.mubr.msk.bf16.mxu1 %vm4417_vm2, %v4416_v22 }
 0x495   : > { %3659 = vmatprep.subr.bf16.mxu1 %v4416_v22 }
 0x499   : > { %3656 = vmatmul.mubr.msk.bf16.vlgmr.msra.gmra.mrb[24].mxu0 %vm1130_vm5, %v1223_v13 }
 0x49a   : > { %3667 = vmatprep.mubr.msk.bf16.mxu0 %vm4417_vm2, %v4416_v22 }
 0x4ae   : > { %v1190_v21 = vpop.xlane.xlu0 %1189 }
 0x4af   : > { %3988 = vrcp.f32 %v1190_v21 }
 0x4b2   : > { %v1196_v23 = vpop.xlane.xlu0 %1195 }
 0x4b3   : > { %3990 = vrcp.f32 %v1196_v23 }
 0x4b6   : > { %v1517_v16 = vpop.permute.xlu0 %1516 }
 0x4b7   : > { %v1522_v24 = vsel %vm1232_vm6, %v1517_v16, 0  ;;  %v1199_v25 = vpop.xlane.xlu1 %1198 }
 0x4b8   : > { %3992 = vrcp.f32 %v1199_v25  ;;  %3666 = vmatpush3.bf16.msra.mxu0 %v1522_v24 }
 0x4b9   : > { %v3989_v26 = vpop.eup %3988  ;;  %3677 = vmatprep.subr.bf16.mxu0 %v4416_v22 }
 0x4ba   : > { %v1214_v27 = vmul.f32 %v3989_v26, %v5014_v49 }
 0x4bb   : > { %v1565_v35 = vpop.permute.xlu1 %1564 }
 0x4bc   : > { %v1222_v28 = vpack.c.bf16 %v1214_v27, %v1214_v27  ;;  %v1570_v39 = vsel %vm1232_vm6, %v1565_v35, 0 }
 0x4bd   : > { %v3991_v29 = vpop.eup %3990 }
 0x4be   : > { %3650 = vmatmul.mubr.msk.bf16.vlgmr.msra.gmra.mrb[28].mxu1 %vm1130_vm5, %v1222_v28  ;;  %v1216_v31 = vmul.f32 %v3991_v29, %v5018_v51 }
 0x4bf   : > { %3660 = vmatpush3.bf16.msra.mxu1 %v1474_v30  ;;  %3661 = vmatprep.mubr.msk.bf16.mxu1 %vm4417_vm2, %v4416_v22  ;;  %v1665_v42 = vpop.permute.xlu1 %1664 }
 0x4c0   : > { %3671 = vmatprep.subr.bf16.mxu1 %v4416_v22  ;;  %v1224_v37 = vpack.c.bf16 %v1216_v31, %v1216_v31  ;;  %v1670_v61 = vsel %vm722_vm3, %v1665_v42, 0 }
 0x4c2   : > { %v3993_v33 = vpop.eup %3992 }
 0x4c3   : > { %v1217_v34 = vmul.f32 %v3993_v33, %v5022_v53  ;;  %v1663_v44 = vpop.permute.xlu1 %1662 }
 0x4c5   : > { %v1225_v38 = vpack.c.bf16 %v1217_v34, %v1217_v34 }
 0x4c6   : > { %3662 = vmatmul.mubr.msk.bf16.vlgmr.msra.gmra.mrb[32].mxu1 %vm1130_vm5, %v1224_v37 }
 0x4c7   : > { %3672 = vmatpush3.bf16.msra.mxu1 %v1570_v39  ;;  %3668 = vmatmul.mubr.msk.bf16.vlgmr.msra.gmra.mrb[28].mxu0 %vm1130_vm5, %v1225_v38  ;;  %v1765_v48 = vpop.permute.xlu1 %1764 }
 0x4c8   : > { %3679 = vmatprep.mubr.msk.bf16.mxu0 %vm4417_vm2, %v4416_v22  ;;  %3673 = vmatprep.mubr.msk.bf16.mxu1 %vm4417_vm2, %v4416_v22  ;;  %v1770_v3 = vsel %vm722_vm3, %v1765_v48, 0 }
 0x4c9   : > { %3683 = vmatprep.subr.bf16.mxu1 %v4416_v22 }
 0x4cb   : > { %v1763_v50 = vpop.permute.xlu1 %1762 }
 0x4cf   : > { %v1865_v54 = vpop.permute.xlu1 %1864 }
 0x4d0   : > { %v1870_v8 = vsel %vm722_vm3, %v1865_v54, 0 }
 0x4d3   : > { %v1863_v62 = vpop.permute.xlu1 %1862 }
 0x4d7   : > { %v1965_v2 = vpop.permute.xlu1 %1964 }
 0x4d8   : > { %v1970_v12 = vsel %vm722_vm3, %v1965_v2, 0 }
 0x4db   : > { %v1963_v6 = vpop.permute.xlu1 %1962 }
 0x4df   : > { %v2125_v9 = vpop.permute.xlu1 %2124 }
 0x4e0   : > { %v2130_v11 = vsel %vm1232_vm6, %v2125_v9, 0 }
 0x4e7   : > { %v1202_v49 = vpop.xlane.xlu0 %1201 }
 0x4e8   : > { %3994 = vrcp.f32 %v1202_v49 }
 0x4eb   : > { %v1615_v51 = vpop.permute.xlu0 %1614 }
 0x4ec   : > { %v1620_v52 = vsel %vm722_vm3, %v1615_v51, 0 }
 0x4ed   : > { %3678 = vmatpush3.bf16.xpose.msra.mxu0 %v1620_v52 }
 0x4ee   : > { %3689 = vmatprep.subr.bf16.mxu0 %v4416_v22 }
 0x4ef   : > { %v1613_v53 = vpop.permute.xlu0 %1612 }
 0x4f2   : > { %v3995_v55 = vpop.eup %3994 }
 0x4f3   : > { %v1218_v56 = vmul.f32 %v3995_v55, %v5043_v58  ;;  %v1715_v57 = vpop.permute.xlu0 %1714 }
 0x4f4   : > { %v1720_v59 = vsel %vm722_vm3, %v1715_v57, 0  ;;  %3680 = vmatmul.mubr.msk.bf16.vlgmr.msra.gmra.mrb[32].mxu0 %vm722_vm3, %v1613_v53 }
 0x4f5   : > { %3690 = vmatpush3.bf16.xpose.msra.mxu0 %v1720_v59  ;;  %v1226_v60 = vpack.c.bf16 %v1218_v56, %v1218_v56  ;;  %3691 = vmatprep.mubr.msk.bf16.mxu0 %vm4417_vm2, %v4416_v22 }
 0x4f6   : > { %3701 = vmatprep.subr.bf16.mxu0 %v4416_v22 }
 0x4f7   : > { %3674 = vmatmul.mubr.msk.bf16.vlgmr.msra.gmra.mrb[36].mxu1 %vm1130_vm5, %v1226_v60  ;;  %v1713_v63 = vpop.permute.xlu0 %1712 }
 0x4f8   : > { %3684 = vmatpush3.bf16.xpose.msra.mxu1 %v1670_v61  ;;  %3685 = vmatprep.mubr.msk.bf16.mxu1 %vm4417_vm2, %v4416_v22 }
 0x4f9   : > { %3695 = vmatprep.subr.bf16.mxu1 %v4416_v22 }
 0x4fb   : > { %v1815_v58 = vpop.permute.xlu0 %1814 }
 0x4fc   : > { %v1820_v0 = vsel %vm722_vm3, %v1815_v58, 0  ;;  %3692 = vmatmul.mubr.msk.bf16.vlgmr.msra.gmra.mrb[36].mxu0 %vm722_vm3, %v1713_v63 }
 0x4fd   : > { %3702 = vmatpush3.bf16.xpose.msra.mxu0 %v1820_v0  ;;  %3703 = vmatprep.mubr.msk.bf16.mxu0 %vm4417_vm2, %v4416_v22 }
 0x4fe   : > { %3713 = vmatprep.subr.bf16.mxu0 %v4416_v22 }
 0x4ff   : > { %3686 = vmatmul.mubr.msk.bf16.vlgmr.msra.gmra.mrb[40].mxu1 %vm722_vm3, %v1663_v44  ;;  %v1813_v5 = vpop.permute.xlu0 %1812 }
 0x500   : > { %3696 = vmatpush3.bf16.xpose.msra.mxu1 %v1770_v3  ;;  %3697 = vmatprep.mubr.msk.bf16.mxu1 %vm4417_vm2, %v4416_v22 }
 0x501   : > { %3707 = vmatprep.subr.bf16.mxu1 %v4416_v22 }
 0x503   : > { %v1915_v36 = vpop.permute.xlu0 %1914 }
 0x504   : > { %v1920_v7 = vsel %vm722_vm3, %v1915_v36, 0  ;;  %3704 = vmatmul.mubr.msk.bf16.vlgmr.msra.gmra.mrb[40].mxu0 %vm722_vm3, %v1813_v5 }
 0x505   : > { %3714 = vmatpush3.bf16.xpose.msra.mxu0 %v1920_v7  ;;  %3715 = vmatprep.mubr.msk.bf16.mxu0 %vm4417_vm2, %v4416_v22 }
 0x506   : > { %3725 = vmatprep.subr.bf16.mxu0 %v4416_v22 }
 0x507   : > { %3698 = vmatmul.mubr.msk.bf16.vlgmr.msra.gmra.mrb[44].mxu1 %vm722_vm3, %v1763_v50  ;;  %v1913_v10 = vpop.permute.xlu0 %1912 }
 0x508   : > { %3708 = vmatpush3.bf16.xpose.msra.mxu1 %v1870_v8  ;;  %3709 = vmatprep.mubr.msk.bf16.mxu1 %vm4417_vm2, %v4416_v22 }
 0x509   : > { %3719 = vmatprep.subr.bf16.mxu1 %v4416_v22 }
 0x50c   : > { %3716 = vmatmul.mubr.msk.bf16.vlgmr.msra.gmra.mrb[44].mxu0 %vm722_vm3, %v1913_v10 }
 0x50d   : > { %3726 = vmatpush3.bf16.msra.mxu0 %v2130_v11  ;;  %3727 = vmatprep.mubr.msk.bf16.mxu0 %vm4417_vm2, %v4416_v22 }
 0x50e   : > { %3737 = vmatprep.subr.bf16.mxu0 %v4416_v22 }
 0x50f   : > { %3710 = vmatmul.mubr.msk.bf16.vlgmr.msra.gmra.mrb[48].mxu1 %vm722_vm3, %v1863_v62 }
 0x510   : > { %3720 = vmatpush3.bf16.xpose.msra.mxu1 %v1970_v12  ;;  %3721 = vmatprep.mubr.msk.bf16.mxu1 %vm4417_vm2, %v4416_v22 }
 0x511   : > { %3731 = vmatprep.subr.bf16.mxu1 %v4416_v22 }
 0x517   : > { %3722 = vmatmul.mubr.msk.bf16.vlgmr.msra.gmra.mrb[52].mxu1 %vm722_vm3, %v1963_v6 }
 0x518   : > { %3733 = vmatprep.mubr.msk.bf16.mxu1 %vm4417_vm2, %v4416_v22 }
 0x55c   : > { %v5155_v14 = vpop.f32.mrb[16].mxu0 }
 0x55d   : > { %v3633_v15 = vpop.f32.mrb[17].mxu0 }
 0x55e   : > { %v1273_v17 = vpop.f32.mrb[18].mxu0 }
 0x55f   : > { %v3634_v18 = vpop.f32.mrb[19].mxu0 }
 0x564   : > { %v5157_v19 = vpop.f32.mrb[20].mxu0 }
 0x565   : > { %v5159_v20 = vpop.f32.mrb[24].mxu1  ;;  %v3645_v13 = vpop.f32.mrb[21].mxu0 }
 0x566   : > { %v3639_v21 = vpop.f32.mrb[25].mxu1  ;;  %v1369_v23 = vpop.f32.mrb[22].mxu0 }
 0x567   : > { %v1321_v16 = vpop.f32.mrb[26].mxu1  ;;  %v3646_v24 = vpop.f32.mrb[23].mxu0 }
 0x568   : > { %v3640_v25 = vpop.f32.mrb[27].mxu1 }
 0x56c   : > { %v5161_v26 = vpop.f32.mrb[24].mxu0 }
 0x56d   : > { %v3657_v27 = vpop.f32.mrb[25].mxu0 }
 0x56e   : > { %v1465_v28 = vpop.f32.mrb[26].mxu0 }
 0x56f   : > { %v3658_v29 = vpop.f32.mrb[27].mxu0 }
 0x591   : > { %v5163_v30 = vpop.f32.mrb[28].mxu1 }
 0x592   : > { %v3651_v31 = vpop.f32.mrb[29].mxu1 }
 0x593   : > { %v1417_v33 = vpop.f32.mrb[30].mxu1 }
 0x594   : > { %v3652_v34 = vpop.f32.mrb[31].mxu1 }
 0x599   : > { %v5165_v35 = vpop.f32.mrb[32].mxu1 }
 0x59a   : > { %v3663_v37 = vpop.f32.mrb[33].mxu1  ;;  %v5167_v38 = vpop.f32.mrb[28].mxu0 }
 0x59b   : > { %v1513_v39 = vpop.f32.mrb[34].mxu1  ;;  %v3669_v42 = vpop.f32.mrb[29].mxu0 }
 0x59c   : > { %v3664_v44 = vpop.f32.mrb[35].mxu1  ;;  %v1561_v48 = vpop.f32.mrb[30].mxu0 }
 0x59d   : > { %v3670_v49 = vpop.f32.mrb[31].mxu0 }
 0x5c7   : > { %v1656_v50 = vpop.f32.mrb[32].mxu0 }
 0x5c8   : > { %v2012_v51 = vmul.f32 0.25, %v1656_v50  ;;  %v3681_v52 = vpop.f32.mrb[33].mxu0 }
 0x5c9   : > { %v1659_v53 = vpop.f32.mrb[34].mxu0 }
 0x5ca   : > { %v5169_v54 = vpop.f32.mrb[36].mxu1  ;;  %v3682_v55 = vpop.f32.mrb[35].mxu0  ;;  %v5173_v56 = vsel %vm4943_vm4, %v2012_v51, -1e+30 }
 0x5cb   : > { %v3675_v57 = vpop.f32.mrb[37].mxu1  ;;  %v2028_v59 = vsel %vm1130_vm5, %v5173_v56, -inf }
 0x5cc   : > { %v1609_v60 = vpop.f32.mrb[38].mxu1  ;;  %2029 = vmax.xlane.f32.xlu0 %v2028_v59 }
 0x5cd   : > { %v3676_v61 = vpop.f32.mrb[39].mxu1 }
 0x5cf   : > { %v1756_v62 = vpop.f32.mrb[36].mxu0 }
 0x5d0   : > { %v2014_v63 = vmul.f32 0.25, %v1756_v62  ;;  %v3693_v58 = vpop.f32.mrb[37].mxu0 }
 0x5d1   : > { %v1759_v0 = vpop.f32.mrb[38].mxu0 }
 0x5d2   : > { %v1706_v2 = vpop.f32.mrb[40].mxu1  ;;  %v3694_v3 = vpop.f32.mrb[39].mxu0  ;;  %v2022_v5 = vsel %vm4943_vm4, %v2014_v63, -1e+30 }
 0x5d3   : > { %v2013_v6 = vmul.f32 0.25, %v1706_v2  ;;  %v3687_v36 = vpop.f32.mrb[41].mxu1  ;;  %v2034_v7 = vsel %vm1130_vm5, %v2022_v5, -inf }
 0x5d4   : > { %v1709_v8 = vpop.f32.mrb[42].mxu1  ;;  %2035 = vmax.xlane.f32.xlu0 %v2034_v7 }
 0x5d5   : > { %v3688_v9 = vpop.f32.mrb[43].mxu1  ;;  %v2021_v10 = vsel %vm4943_vm4, %v2013_v6, -1e+30 }
 0x5d6   : > { %v2031_v11 = vsel %vm1130_vm5, %v2021_v10, -inf }
 0x5d7   : > { %2032 = vmax.xlane.f32.xlu1 %v2031_v11  ;;  %v1856_v12 = vpop.f32.mrb[40].mxu0 }
 0x5d8   : > { %v2016_v15 = vmul.f32 0.25, %v1856_v12  ;;  %v3705_v17 = vpop.f32.mrb[41].mxu0 }
 0x5d9   : > { %v1859_v18 = vpop.f32.mrb[42].mxu0 }
 0x5da   : > { %v1806_v13 = vpop.f32.mrb[44].mxu1  ;;  %v3706_v21 = vpop.f32.mrb[43].mxu0  ;;  %v5185_v23 = vsel %vm4943_vm4, %v2016_v15, -1e+30 }
 0x5db   : > { %v2015_v16 = vmul.f32 0.25, %v1806_v13  ;;  %v3699_v24 = vpop.f32.mrb[45].mxu1  ;;  %v2040_v25 = vsel %vm1130_vm5, %v5185_v23, -inf }
 0x5dc   : > { %v1809_v27 = vpop.f32.mrb[46].mxu1  ;;  %2041 = vmax.xlane.f32.xlu1 %v2040_v25 }
 0x5dd   : > { %v3700_v28 = vpop.f32.mrb[47].mxu1  ;;  %v2023_v29 = vsel %vm4943_vm4, %v2015_v16, -1e+30 }
 0x5de   : > { %v2037_v31 = vsel %vm1130_vm5, %v2023_v29, -inf }
 0x5df   : > { %2038 = vmax.xlane.f32.xlu0 %v2037_v31  ;;  %v1956_v33 = vpop.f32.mrb[44].mxu0 }
 0x5e0   : > { %v2018_v34 = vmul.f32 0.25, %v1956_v33  ;;  %v3717_v37 = vpop.f32.mrb[45].mxu0 }
 0x5e1   : > { %v1959_v39 = vpop.f32.mrb[46].mxu0 }
 0x5e2   : > { %v1906_v42 = vpop.f32.mrb[48].mxu1  ;;  %v3718_v44 = vpop.f32.mrb[47].mxu0  ;;  %v5194_v48 = vsel %vm4943_vm4, %v2018_v34, -1e+30 }
 0x5e3   : > { %v2017_v49 = vmul.f32 0.25, %v1906_v42  ;;  %v3711_v50 = vpop.f32.mrb[49].mxu1  ;;  %v2046_v51 = vsel %vm1130_vm5, %v5194_v48, -inf }
 0x5e4   : > { %v1909_v52 = vpop.f32.mrb[50].mxu1  ;;  %2047 = vmax.xlane.f32.xlu1 %v2046_v51 }
 0x5e5   : > { %v3712_v53 = vpop.f32.mrb[51].mxu1  ;;  %v2025_v55 = vsel %vm4943_vm4, %v2017_v49, -1e+30 }
 0x5e6   : > { %v2043_v57 = vsel %vm1130_vm5, %v2025_v55, -inf }
 0x5e7   : > { %2044 = vmax.xlane.f32.xlu0 %v2043_v57 }
 0x5ea   : > { %v2006_v59 = vpop.f32.mrb[52].mxu1 }
 0x5eb   : > { %v2019_v60 = vmul.f32 0.25, %v2006_v59  ;;  %v3723_v61 = vpop.f32.mrb[53].mxu1 }
 0x5ec   : > { %v2009_v62 = vpop.f32.mrb[54].mxu1 }
 0x5ed   : > { %v3724_v63 = vpop.f32.mrb[55].mxu1  ;;  %v2027_v58 = vsel %vm4943_vm4, %v2019_v60, -1e+30 }
 0x5ee   : > { %v2049_v0 = vsel %vm1130_vm5, %v2027_v58, -inf }
 0x5ef   : > { %2050 = vmax.xlane.f32.xlu0 %v2049_v0 }
 0x5f5   : > { %2220 = vrot.lane.b32.xlu1 %v4868_v32, %s4422_s10 }
 0x5f9   : > { %2268 = vrot.lane.b32.xlu1 %v4874_v40, %s4422_s10 }
 0x605   : > { %2172 = vrot.lane.b32.xlu0 %v4876_v41, %s4422_s10 }
 0x659   : > { %v2030_v2 = vpop.xlane.xlu0 %2029 }
 0x65a   : > { %v2052_v3 = vsub.f32 %v5173_v56, %v2030_v2 }
 0x65c   : > { %v2060_v6 = vmul.f32 1.442695, %v2052_v3 }
 0x65e   : > { %3996 = vpow2.f32 %v2060_v6 }
 0x661   : > { %v2036_v36 = vpop.xlane.xlu0 %2035 }
 0x662   : > { %v2054_v4 = vsub.f32 %v2022_v5, %v2036_v36 }
 0x664   : > { %v2064_v7 = vmul.f32 1.442695, %v2054_v4  ;;  %v2033_v8 = vpop.xlane.xlu1 %2032 }
 0x665   : > { %v2053_v9 = vsub.f32 %v2021_v10, %v2033_v8 }
 0x666   : > { %3998 = vpow2.f32 %v2064_v7 }
 0x667   : > { %v2062_v11 = vmul.f32 1.442695, %v2053_v9 }
 0x668   : > { %v3997_v12 = vpop.eup %3996 }
 0x669   : > { %4000 = vpow2.f32 %v2062_v11  ;;  %v2076_v32 = vsel %vm1130_vm5, %v3997_v12, 0.0  ;;  %v2042_v27 = vpop.xlane.xlu1 %2041 }
 0x66a   : > { %2077 = vadd.xlane.f32.xlu1 %v2076_v32  ;;  %v2056_v28 = vsub.f32 %v5185_v23, %v2042_v27 }
 0x66c   : > { %v2039_v40 = vpop.xlane.xlu0 %2038  ;;  %v2068_v31 = vmul.f32 1.442695, %v2056_v28 }
 0x66d   : > { %v2055_v15 = vsub.f32 %v2023_v29, %v2039_v40 }
 0x66f   : > { %v2066_v41 = vmul.f32 1.442695, %v2055_v15 }
 0x670   : > { %v5212_v17 = vpop.eup %3998 }
 0x671   : > { %4002 = vpow2.f32 %v2066_v41  ;;  %v2082_v56 = vsel %vm1130_vm5, %v5212_v17, 0.0  ;;  %v2048_v29 = vpop.xlane.xlu1 %2047 }
 0x672   : > { %2083 = vadd.xlane.f32.xlu1 %v2082_v56  ;;  %v2058_v33 = vsub.f32 %v5194_v48, %v2048_v29  ;;  %4004 = vpow2.f32 %v2068_v31 }
 0x673   : > { %v5216_v5 = vpop.eup %4000 }
 0x674   : > { %v2079_v10 = vsel %vm1130_vm5, %v5216_v5, 0.0  ;;  %v2045_v18 = vpop.xlane.xlu0 %2044  ;;  %v2072_v34 = vmul.f32 1.442695, %v2058_v33 }
 0x675   : > { %2080 = vadd.xlane.f32.xlu0 %v2079_v10  ;;  %v2057_v37 = vsub.f32 %v2025_v55, %v2045_v18  ;;  %v2221_v53 = vpop.permute.xlu1 %2220 }
 0x676   : > { %4006 = vpow2.f32 %v2072_v34 }
 0x677   : > { %v2070_v39 = vmul.f32 1.442695, %v2057_v37 }
 0x679   : > { %4008 = vpow2.f32 %v2070_v39  ;;  %v2269_v55 = vpop.permute.xlu1 %2268 }
 0x67a   : > { %v2274_v8 = vsel %vm1232_vm6, %v2269_v55, 0 }
 0x67b   : > { %v5220_v13 = vpop.eup %4002 }
 0x67c   : > { %v2051_v21 = vpop.xlane.xlu0 %2050  ;;  %v2085_v16 = vsel %vm1130_vm5, %v5220_v13, 0.0  ;;  %v5232_v44 = vpop.eup %4004 }
 0x67d   : > { %2086 = vadd.xlane.f32.xlu0 %v2085_v16  ;;  %v2059_v42 = vsub.f32 %v2027_v58, %v2051_v21  ;;  %v2088_v23 = vsel %vm1130_vm5, %v5232_v44, 0.0  ;;  %v2226_v58 = vsel %vm1232_vm6, %v2221_v53, 0 }
 0x680   : > { %v2173_v24 = vpop.permute.xlu0 %2172  ;;  %v5236_v49 = vpop.eup %4006 }
 0x681   : > { %v2178_v25 = vsel %vm1232_vm6, %v2173_v24, 0 }
 0x682   : > { %3732 = vmatpush3.bf16.msra.mxu1 %v2178_v25 }
 0x683   : > { %2364 = vrot.lane.b32.xlu1 %v4879_v43, %s4422_s10  ;;  %3743 = vmatprep.subr.bf16.mxu1 %v4416_v22  ;;  %v2074_v43 = vmul.f32 1.442695, %v2059_v42  ;;  %v5240_v48 = vpop.eup %4008 }
 0x684   : > { %v2091_v50 = vsel %vm1130_vm5, %v5240_v48, 0.0 }
 0x685   : > { %4010 = vpow2.f32 %v2074_v43 }
 0x68f   : > { %v5244_v51 = vpop.eup %4010 }
 0x690   : > { %v2097_v52 = vsel %vm1130_vm5, %v5244_v51, 0.0 }
 0x693   : > { %2316 = vrot.lane.b32.xlu0 %v4881_v45, %s4422_s10  ;;  %v2094_v45 = vsel %vm1130_vm5, %v5236_v49, 0.0 }
 0x6a7   : > { %2089 = vadd.xlane.f32.xlu1 %v2088_v23 }
 0x6ab   : > { %2095 = vadd.xlane.f32.xlu1 %v2094_v45 }
 0x6b2   : > { %2092 = vadd.xlane.f32.xlu0 %v2091_v50  ;;  %v3957_v50 = vld [vmem:[%s477_s8 + $0x8] sm:$0xff]  }
 0x6b6   : > { %2098 = vadd.xlane.f32.xlu0 %v2097_v52 }
 0x6bc   : > { %2460 = vrot.lane.b32.xlu1 %v4884_v46, %s4422_s10 }
 0x6cc   : > { %2412 = vrot.lane.b32.xlu0 %v4887_v47, %s4422_s10 }
 0x6f7   : > { %v2078_v57 = vpop.xlane.xlu1 %2077 }
 0x6f8   : > { %4012 = vrcp.f32 %v2078_v57 }
 0x6ff   : > { %v2084_v59 = vpop.xlane.xlu1 %2083 }
 0x700   : > { %4014 = vrcp.f32 %v2084_v59 }
 0x702   : > { %v4013_v60 = vpop.eup %4012  ;;  %v2081_v61 = vpop.xlane.xlu0 %2080 }
 0x703   : > { %v2108_v62 = vmul.f32 %v4013_v60, %v3997_v12  ;;  %4016 = vrcp.f32 %v2081_v61  ;;  %v2365_v12 = vpop.permute.xlu1 %2364 }
 0x704   : > { %v2370_v40 = vsel %vm1232_vm6, %v2365_v12, 0 }
 0x705   : > { %v2116_v63 = vpack.c.bf16 %v2108_v62, %v2108_v62 }
 0x707   : > { %3728 = vmatmul.mubr.msk.bf16.vlgmr.msra.gmra.mrb[48].mxu0 %vm1130_vm5, %v2116_v63 }
 0x708   : > { %3738 = vmatpush3.bf16.msra.mxu0 %v2226_v58  ;;  %3739 = vmatprep.mubr.msk.bf16.mxu0 %vm4417_vm2, %v4416_v22 }
 0x709   : > { %3749 = vmatprep.subr.bf16.mxu0 %v4416_v22 }
 0x70a   : > { %v4015_v46 = vpop.eup %4014  ;;  %v2087_v47 = vpop.xlane.xlu0 %2086 }
 0x70b   : > { %v2110_v0 = vmul.f32 %v4015_v46, %v5212_v17  ;;  %4018 = vrcp.f32 %v2087_v47 }
 0x70d   : > { %v4017_v2 = vpop.eup %4016  ;;  %v2118_v3 = vpack.c.bf16 %v2110_v0, %v2110_v0 }
 0x70e   : > { %v2109_v6 = vmul.f32 %v4017_v2, %v5216_v5  ;;  %v2317_v36 = vpop.permute.xlu0 %2316 }
 0x70f   : > { %v2322_v4 = vsel %vm1232_vm6, %v2317_v36, 0  ;;  %3740 = vmatmul.mubr.msk.bf16.vlgmr.msra.gmra.mrb[52].mxu0 %vm1130_vm5, %v2118_v3 }
 0x710   : > { %3750 = vmatpush3.bf16.msra.mxu0 %v2322_v4  ;;  %v2117_v7 = vpack.c.bf16 %v2109_v6, %v2109_v6  ;;  %3751 = vmatprep.mubr.msk.bf16.mxu0 %vm4417_vm2, %v4416_v22 }
 0x711   : > { %3761 = vmatprep.subr.bf16.mxu0 %v4416_v22 }
 0x712   : > { %3734 = vmatmul.mubr.msk.bf16.vlgmr.msra.gmra.mrb[56].mxu1 %vm1130_vm5, %v2117_v7 }
 0x713   : > { %3744 = vmatpush3.bf16.msra.mxu1 %v2274_v8  ;;  %3745 = vmatprep.mubr.msk.bf16.mxu1 %vm4417_vm2, %v4416_v22 }
 0x714   : > { %3755 = vmatprep.subr.bf16.mxu1 %v4416_v22 }
 0x715   : > { %v4019_v9 = vpop.eup %4018 }
 0x716   : > { %v2111_v11 = vmul.f32 %v4019_v9, %v5220_v13 }
 0x718   : > { %v2119_v32 = vpack.c.bf16 %v2111_v11, %v2111_v11 }
 0x71a   : > { %3746 = vmatmul.mubr.msk.bf16.vlgmr.msra.gmra.mrb[60].mxu1 %vm1130_vm5, %v2119_v32 }
 0x71b   : > { %3756 = vmatpush3.bf16.msra.mxu1 %v2370_v40  ;;  %3757 = vmatprep.mubr.msk.bf16.mxu1 %vm4417_vm2, %v4416_v22 }
 0x71c   : > { %3767 = vmatprep.subr.bf16.mxu1 %v4416_v22 }
 0x734   : > { %v2090_v15 = vpop.xlane.xlu1 %2089 }
 0x735   : > { %4020 = vrcp.f32 %v2090_v15 }
 0x738   : > { %v2096_v41 = vpop.xlane.xlu1 %2095 }
 0x739   : > { %4022 = vrcp.f32 %v2096_v41 }
 0x73c   : > { %v2461_v29 = vpop.permute.xlu1 %2460 }
 0x73d   : > { %v2466_v34 = vsel %vm1232_vm6, %v2461_v29, 0 }
 0x73f   : > { %v4021_v17 = vpop.eup %4020  ;;  %v2093_v56 = vpop.xlane.xlu0 %2092 }
 0x740   : > { %v2112_v5 = vmul.f32 %v4021_v17, %v5232_v44  ;;  %4024 = vrcp.f32 %v2093_v56 }
 0x742   : > { %v2120_v10 = vpack.c.bf16 %v2112_v5, %v2112_v5 }
 0x743   : > { %v4023_v18 = vpop.eup %4022  ;;  %v2099_v13 = vpop.xlane.xlu0 %2098 }
 0x744   : > { %4026 = vrcp.f32 %v2099_v13  ;;  %3752 = vmatmul.mubr.msk.bf16.vlgmr.msra.gmra.mrb[56].mxu0 %vm1130_vm5, %v2120_v10  ;;  %v2114_v21 = vmul.f32 %v4023_v18, %v5236_v49  ;;  %v3956_v49 = vld [vmem:[%s477_s8] sm:$0xff]  }
 0x745   : > { %3763 = vmatprep.mubr.msk.bf16.mxu0 %vm4417_vm2, %v4416_v22 }
 0x746   : > { %v2122_v27 = vpack.c.bf16 %v2114_v21, %v2114_v21 }
 0x747   : > { %v2413_v16 = vpop.permute.xlu0 %2412 }
 0x748   : > { %v2418_v24 = vsel %vm1232_vm6, %v2413_v16, 0 }
 0x749   : > { %3762 = vmatpush3.bf16.msra.mxu0 %v2418_v24 }
 0x74a   : > { %v4025_v25 = vpop.eup %4024  ;;  %3773 = vmatprep.subr.bf16.mxu0 %v3956_v49 }
 0x74b   : > { %v2113_v28 = vmul.f32 %v4025_v25, %v5240_v48 }
 0x74c   : > { %3764 = vmatmul.mubr.msk.bf16.vlgmr.msra.gmra.mrb[60].mxu0 %vm1130_vm5, %v2122_v27 }
 0x74d   : > { %v2121_v31 = vpack.c.bf16 %v2113_v28, %v2113_v28  ;;  %3774 = vmatpush3.bf16.msra.mxu0 %v3956_v49 }
 0x74e   : > { %v4027_v33 = vpop.eup %4026  ;;  %3775 = vmatprep.subr.bf16.mxu0 %v3957_v50 }
 0x74f   : > { %3758 = vmatmul.mubr.msk.bf16.vlgmr.msra.gmra.mrb[64].mxu1 %vm1130_vm5, %v2121_v31  ;;  %v2115_v37 = vmul.f32 %v4027_v33, %v5244_v51 }
 0x750   : > { %3768 = vmatpush3.bf16.msra.mxu1 %v2466_v34  ;;  %3769 = vmatprep.mubr.msk.bf16.mxu1 %vm4417_vm2, %v4416_v22 }
 0x751   : > { %v2123_v39 = vpack.c.bf16 %v2115_v37, %v2115_v37  ;;  %3776 = vmatpush3.bf16.msra.mxu0 %v3957_v50 }
 0x757   : > { %3770 = vmatmul.mubr.msk.bf16.vlgmr.msra.gmra.mrb[68].mxu1 %vm1130_vm5, %v2123_v39 }
 0x7da   : > { %v2166_v42 = vpop.f32.mrb[48].mxu0 }
 0x7db   : > { %v3729_v44 = vpop.f32.mrb[49].mxu0 }
 0x7dc   : > { %v2169_v43 = vpop.f32.mrb[50].mxu0 }
 0x7dd   : > { %v3730_v23 = vpop.f32.mrb[51].mxu0 }
 0x7de   : > { %v5315_v23 = vld [vmem:[%s4845_s11] sm:$0x3f] }
 0x7e2   : > { %v2262_v45 = vpop.f32.mrb[52].mxu0 }
 0x7e3   : > { %v3741_v48 = vpop.f32.mrb[53].mxu0 }
 0x7e4   : > { %v2265_v52 = vpop.f32.mrb[54].mxu0 }
 0x7e5   : > { %v2214_v53 = vpop.f32.mrb[56].mxu1  ;;  %v3742_v22 = vpop.f32.mrb[55].mxu0 }
 0x7e6   : > { %v3934_v51 = vpack.i.bf16 %v2214_v53, %v2166_v42  ;;  %v3735_v55 = vpop.f32.mrb[57].mxu1 }
 0x7e7   : > { %v2217_v57 = vpop.f32.mrb[58].mxu1 }
 0x7e8   : > { %3935 = vrot.lane.b32.xlu0 %v3934_v51, %s4423_s25  ;;  %v3736_v59 = vpop.f32.mrb[59].mxu1  ;;  %v4061_v57 = vld [vmem:[#allocation2 + $0x8] sm:$0xff] }
 0x7ed   : > { %v2310_v60 = vpop.f32.mrb[60].mxu1 }
 0x7ee   : > { %v3939_v61 = vpack.i.bf16 %v2310_v60, %v2262_v45  ;;  %v3747_v62 = vpop.f32.mrb[61].mxu1  ;;  %v4062_v60 = vld [vmem:[#allocation2 + $0x10] sm:$0xff] }
 0x7ef   : > { %v2313_v63 = vpop.f32.mrb[62].mxu1 }
 0x7f0   : > { %3940 = vrot.lane.b32.xlu1 %v3939_v61, %s4423_s25  ;;  %v3748_v58 = vpop.f32.mrb[63].mxu1 }
 0x7f1   : > { %v4063_v58 = vld [vmem:[#allocation2 + $0x18] sm:$0xff] }
 0x817   : > { %v2358_v46 = vpop.f32.mrb[56].mxu0 }
 0x818   : > { %v3753_v47 = vpop.f32.mrb[57].mxu0 }
 0x819   : > { %v2361_v0 = vpop.f32.mrb[58].mxu0 }
 0x81a   : > { %v3754_v2 = vpop.f32.mrb[59].mxu0 }
 0x81f   : > { %v2454_v3 = vpop.f32.mrb[60].mxu0 }
 0x820   : > { %v3765_v6 = vpop.f32.mrb[61].mxu0 }
 0x821   : > { %v2457_v36 = vpop.f32.mrb[62].mxu0 }
 0x822   : > { %v2406_v4 = vpop.f32.mrb[64].mxu1  ;;  %v3766_v7 = vpop.f32.mrb[63].mxu0 }
 0x823   : > { %v3944_v8 = vpack.i.bf16 %v2406_v4, %v2358_v46  ;;  %v3759_v9 = vpop.f32.mrb[65].mxu1 }
 0x824   : > { %v2409_v11 = vpop.f32.mrb[66].mxu1  ;;  %v4064_v9 = vld [vmem:[#allocation2 + $0x20] sm:$0xff] }
 0x825   : > { %3945 = vrot.lane.b32.xlu0 %v3944_v8, %s4423_s25  ;;  %v3760_v12 = vpop.f32.mrb[67].mxu1 }
 0x82a   : > { %v2502_v32 = vpop.f32.mrb[68].mxu1 }
 0x82b   : > { %v3949_v40 = vpack.i.bf16 %v2502_v32, %v2454_v3  ;;  %v3771_v15 = vpop.f32.mrb[69].mxu1  ;;  %v4065_v32 = vld [vmem:[#allocation2 + $0x28] sm:$0xff] }
 0x82c   : > { %v2505_v41 = vpop.f32.mrb[70].mxu1  ;;  %v4066_v15 = vld [vmem:[#allocation2 + $0x30] sm:$0xff] }
 0x82d   : > { %v3772_v17 = vpop.f32.mrb[71].mxu1  ;;  %3950 = vrot.lane.b32.xlu1 %v3949_v40, %s4423_s25 }
 0x85a   : > { %v3936_v56 = vpop.permute.xlu0 %3935 }
 0x85b   : > { %v3938_v5 = vunpack.i.h.bf16 %v3936_v56  ;;  %v3937_v10 = vunpack.i.l.bf16 %v3936_v56  ;;  %v4067_v56 = vld [vmem:[#allocation2 + $0x38] sm:$0xff] }
 0x85d   : > { %v2541_v18 = vsel %vm722_vm3, %v5159_v20, %v3938_v5  ;;  %v2540_v13 = vsel %vm722_vm3, %v5155_v14, %v3937_v10 }
 0x85e   : > { %v2548_v21 = vpack.c.bf16 %v2541_v18, %v2540_v13 }
 0x860   : > { %3777 = vmatprep.mubr.msk.bf16.mxu0 %vm628_vm1, %v2548_v21 }
 0x862   : > { %v3941_v16 = vpop.permute.xlu1 %3940 }
 0x863   : > { %v3943_v24 = vunpack.i.h.bf16 %v3941_v16  ;;  %v3942_v25 = vunpack.i.l.bf16 %v3941_v16 }
 0x865   : > { %v2543_v27 = vsel %vm722_vm3, %v5163_v30, %v3943_v24  ;;  %v2542_v28 = vsel %vm722_vm3, %v5157_v19, %v3942_v25 }
 0x866   : > { %v2549_v29 = vpack.c.bf16 %v2543_v27, %v2542_v28 }
 0x868   : > { %3778 = vmatmul.mubr.msk.bf16.vlgmr.msra.gmra.mrb[64].mxu0 %vm628_vm1, %v2549_v29 }
 0x897   : > { %v3946_v20 = vpop.permute.xlu0 %3945 }
 0x898   : > { %v3948_v31 = vunpack.i.h.bf16 %v3946_v20  ;;  %v3947_v33 = vunpack.i.l.bf16 %v3946_v20 }
 0x89a   : > { %v2545_v14 = vsel %vm722_vm3, %v5165_v35, %v3948_v31  ;;  %v2544_v34 = vsel %vm722_vm3, %v5161_v26, %v3947_v33  ;;  %v2558_v35 = vsub.s32 0, %v4940_v1 }
 0x89b   : > { %v2550_v37 = vpack.c.bf16 %v2545_v14, %v2544_v34 }
 0x89c   : > { %v2559_v26 = vrot.slane %v5315_v23, %v2558_v35  ;;  %v3958_v35 = vld [vmem:[%s486_s17] sm:$0xff]  }
 0x89d   : > { %3781 = vmatprep.mubr.msk.bf16.mxu0 %vm628_vm1, %v2550_v37  ;;  %3785 = vmatprep.subr.bf16.mxu1 %v3958_v35 }
 0x89e   : > { %3786 = vmatpush3.bf16.msra.mxu1 %v3958_v35 }
 0x89f   : > { %v3951_v30 = vpop.permute.xlu1 %3950 }
 0x8a0   : > { %v3953_v39 = vunpack.i.h.bf16 %v3951_v30  ;;  %v3952_v42 = vunpack.i.l.bf16 %v3951_v30 }
 0x8a2   : > { %v2547_v19 = vsel %vm722_vm3, %v5169_v54, %v3953_v39  ;;  %v2546_v44 = vsel %vm722_vm3, %v5167_v38, %v3952_v42  ;;  %v4060_v54 = vld [vmem:[#allocation2] sm:$0xff] }
 0x8a3   : > { %v2551_v43 = vpack.c.bf16 %v2547_v19, %v2546_v44 }
 0x8a5   : > { %3782 = vmatmul.mubr.msk.bf16.gmra.mrb[68].mxu0 %vm628_vm1, %v2551_v43 }
 0x93b   : > { %v3779_v49 = vpop.f32.mrb[64].mxu0 }
 0x93c   : > { %v2618_v45 = vpop.f32.mrb[65].mxu0  ;;  %v2627_v48 = vadd.f32 %v3779_v49, %v2559_v26 }
 0x93d   : > { %v2619_v50 = vadd.f32 %v2618_v45, %v2559_v26  ;;  %v3780_v52 = vpop.f32.mrb[66].mxu0 }
 0x93e   : > { %v2621_v53 = vpop.f32.mrb[67].mxu0  ;;  %v2630_v55 = vadd.f32 %v3780_v52, %v2559_v26  ;;  %v2651_v61 = vadd.f32 %v4062_v60, %v2627_v48 }
 0x93f   : > { %v2622_v22 = vadd.f32 %v2621_v53, %v2559_v26  ;;  %v2649_v51 = vadd.f32 %v4060_v54, %v2619_v50 }
 0x940   : > { %v2663_v63 = vsel %vm628_vm1, %v2651_v61, 0.0  ;;  %v2652_v46 = vadd.f32 %v4063_v58, %v2630_v55 }
 0x941   : > { %v2657_v38 = vsel %vm628_vm1, %v2649_v51, 0.0  ;;  %v2650_v59 = vadd.f32 %v4061_v57, %v2622_v22 }
 0x942   : > { %2658 = vadd.xlane.f32.xlu0 %v2657_v38  ;;  %v2666_v47 = vsel %vm628_vm1, %v2652_v46, 0.0 }
 0x943   : > { %v2660_v62 = vsel %vm628_vm1, %v2650_v59, 0.0 }
 0x944   : > { %2661 = vadd.xlane.f32.xlu1 %v2660_v62 }
 0x946   : > { %2664 = vadd.xlane.f32.xlu0 %v2663_v63 }
 0x94a   : > { %2667 = vadd.xlane.f32.xlu0 %v2666_v47 }
 0x978   : > { %v3783_v0 = vpop.f32.mrb[68].mxu0 }
 0x979   : > { %v2643_v2 = vadd.f32 %v3783_v0, %v2559_v26  ;;  %v2634_v3 = vpop.f32.mrb[69].mxu0  ;;  %v3960_v0 = vld [vmem:[%s4842_s24] sm:$0xff]  }
 0x97a   : > { %v2635_v6 = vadd.f32 %v2634_v3, %v2559_v26  ;;  %v3784_v36 = vpop.f32.mrb[70].mxu0  ;;  %3797 = vmatprep.subr.bf16.mxu0 %v3960_v0 }
 0x97b   : > { %v2646_v4 = vadd.f32 %v3784_v36, %v2559_v26  ;;  %v2637_v7 = vpop.f32.mrb[71].mxu0  ;;  %v2655_v41 = vadd.f32 %v4066_v15, %v2643_v2  ;;  %v3961_v2 = vld [vmem:[%s4842_s24 + $0x8] sm:$0xff]   ;;  %3798 = vmatpush3.bf16.msra.mxu0 %v3960_v0  ;;  %v2764_v15 = vsub.s32 1, %v4940_v1 }
 0x97c   : > { %v2638_v8 = vadd.f32 %v2637_v7, %v2559_v26  ;;  %v2653_v11 = vadd.f32 %v4064_v9, %v2635_v6  ;;  %v3959_v26 = vld [vmem:[%s486_s17 + $0x8] sm:$0xff]   ;;  %3799 = vmatprep.subr.bf16.mxu0 %v3961_v2 }
 0x97d   : > { %v2656_v5 = vadd.f32 %v4067_v56, %v2646_v4  ;;  %v2675_v10 = vsel %vm628_vm1, %v2655_v41, 0.0  ;;  %3787 = vmatprep.subr.bf16.mxu1 %v3959_v26  ;;  %v2776_v56 = vsub.s32 2, %v4940_v1 }
 0x97e   : > { %v2669_v12 = vsel %vm628_vm1, %v2653_v11, 0.0  ;;  %v2654_v40 = vadd.f32 %v4065_v32, %v2638_v8  ;;  %3788 = vmatpush3.bf16.msra.mxu1 %v3959_v26 }
 0x97f   : > { %2670 = vadd.xlane.f32.xlu1 %v2669_v12  ;;  %v2678_v18 = vsel %vm628_vm1, %v2656_v5, 0.0  ;;  %3800 = vmatpush3.bf16.msra.mxu0 %v3961_v2 }
 0x980   : > { %v2672_v17 = vsel %vm628_vm1, %v2654_v40, 0.0 }
 0x981   : > { %2673 = vadd.xlane.f32.xlu0 %v2672_v17  ;;  %v2765_v17 = vrot.slane %v5315_v23, %v2764_v15 }
 0x983   : > { %2676 = vadd.xlane.f32.xlu1 %v2675_v10 }
 0x985   : > { %2679 = vadd.xlane.f32.xlu0 %v2678_v18 }
 0x9cf   : > { %v2659_v13 = vpop.xlane.xlu0 %2658 }
 0x9d0   : > { %v2682_v21 = vmul.f32 0.03125, %v2659_v13 }
 0x9d1   : > { %v2662_v16 = vpop.xlane.xlu1 %2661 }
 0x9d2   : > { %v5326_v24 = vsub.f32 %v2649_v51, %v2682_v21  ;;  %v2683_v25 = vmul.f32 0.03125, %v2662_v16  ;;  %v2777_v16 = vrot.slane %v5315_v23, %v2776_v56 }
 0x9d3   : > { %v2665_v27 = vpop.xlane.xlu0 %2664 }
 0x9d4   : > { %v5328_v28 = vsub.f32 %v2650_v59, %v2683_v25  ;;  %v2684_v29 = vmul.f32 0.03125, %v2665_v27  ;;  %v2698_v20 = vmul.f32 %v5326_v24, %v5326_v24 }
 0x9d6   : > { %v5332_v31 = vsub.f32 %v2651_v61, %v2684_v29  ;;  %v2706_v33 = vsel %vm628_vm1, %v2698_v20, 0.0  ;;  %v2699_v14 = vmul.f32 %v5328_v28, %v5328_v28 }
 0x9d7   : > { %2707 = vadd.xlane.f32.xlu1 %v2706_v33  ;;  %v2668_v34 = vpop.xlane.xlu0 %2667 }
 0x9d8   : > { %v2685_v37 = vmul.f32 0.03125, %v2668_v34  ;;  %v2709_v30 = vsel %vm628_vm1, %v2699_v14, 0.0  ;;  %v2700_v39 = vmul.f32 %v5332_v31, %v5332_v31 }
 0x9d9   : > { %2710 = vadd.xlane.f32.xlu0 %v2709_v30 }
 0x9da   : > { %v5340_v42 = vsub.f32 %v2652_v46, %v2685_v37  ;;  %v2712_v19 = vsel %vm628_vm1, %v2700_v39, 0.0 }
 0x9db   : > { %2713 = vadd.xlane.f32.xlu1 %v2712_v19 }
 0x9dc   : > { %v2701_v44 = vmul.f32 %v5340_v42, %v5340_v42 }
 0x9de   : > { %v2715_v43 = vsel %vm628_vm1, %v2701_v44, 0.0 }
 0x9df   : > { %2716 = vadd.xlane.f32.xlu0 %v2715_v43 }
 0xa0c   : > { %v2671_v49 = vpop.xlane.xlu1 %2670 }
 0xa0d   : > { %v2686_v45 = vmul.f32 0.03125, %v2671_v49 }
 0xa0e   : > { %v2674_v48 = vpop.xlane.xlu0 %2673 }
 0xa0f   : > { %v5350_v50 = vsub.f32 %v2653_v11, %v2686_v45  ;;  %v2687_v52 = vmul.f32 0.03125, %v2674_v48 }
 0xa10   : > { %v2677_v53 = vpop.xlane.xlu1 %2676 }
 0xa11   : > { %v5352_v22 = vsub.f32 %v2654_v40, %v2687_v52  ;;  %v2688_v54 = vmul.f32 0.03125, %v2677_v53  ;;  %v2702_v51 = vmul.f32 %v5350_v50, %v5350_v50 }
 0xa12   : > { %v2680_v55 = vpop.xlane.xlu0 %2679 }
 0xa13   : > { %v5356_v38 = vsub.f32 %v2655_v41, %v2688_v54  ;;  %v2689_v57 = vmul.f32 0.03125, %v2680_v55  ;;  %v2718_v59 = vsel %vm628_vm1, %v2702_v51, 0.0  ;;  %v2703_v60 = vmul.f32 %v5352_v22, %v5352_v22 }
 0xa14   : > { %2719 = vadd.xlane.f32.xlu1 %v2718_v59 }
 0xa15   : > { %v5361_v61 = vsub.f32 %v2656_v5, %v2689_v57  ;;  %v2721_v62 = vsel %vm628_vm1, %v2703_v60, 0.0  ;;  %v2704_v63 = vmul.f32 %v5356_v38, %v5356_v38 }
 0xa16   : > { %2722 = vadd.xlane.f32.xlu0 %v2721_v62 }
 0xa17   : > { %v2724_v58 = vsel %vm628_vm1, %v2704_v63, 0.0  ;;  %v2705_v46 = vmul.f32 %v5361_v61, %v5361_v61 }
 0xa18   : > { %2725 = vadd.xlane.f32.xlu1 %v2724_v58 }
 0xa19   : > { %v2727_v47 = vsel %vm628_vm1, %v2705_v46, 0.0 }
 0xa1a   : > { %2728 = vadd.xlane.f32.xlu0 %v2727_v47 }
 0xa64   : > { %v2708_v3 = vpop.xlane.xlu1 %2707 }
 0xa65   : > { %v2730_v6 = vmul.f32 0.03125, %v2708_v3 }
 0xa66   : > { %v2711_v36 = vpop.xlane.xlu0 %2710 }
 0xa67   : > { %v2738_v4 = vadd.f32 1e-05, %v2730_v6  ;;  %v2731_v7 = vmul.f32 0.03125, %v2711_v36 }
 0xa68   : > { %v2714_v8 = vpop.xlane.xlu1 %2713 }
 0xa69   : > { %4028 = vrsqrt.f32 %v2738_v4  ;;  %v2739_v9 = vadd.f32 1e-05, %v2731_v7  ;;  %v2732_v11 = vmul.f32 0.03125, %v2714_v8  ;;  %v3963_v4 = vld [vmem:[%s4842_s24 + $0x18] sm:$0xff]  }
 0xa6a   : > { %v3455_v7 = vld [vmem:[%s494_s14] ss:$0 sm:$0xff] }
 0xa6b   : > { %4030 = vrsqrt.f32 %v2739_v9  ;;  %v2740_v12 = vadd.f32 1e-05, %v2732_v11 }
 0xa6c   : > { %v2717_v32 = vpop.xlane.xlu0 %2716 }
 0xa6d   : > { %4032 = vrsqrt.f32 %v2740_v12  ;;  %v2733_v40 = vmul.f32 0.03125, %v2717_v32 }
 0xa6f   : > { %v2741_v41 = vadd.f32 1e-05, %v2733_v40 }
 0xa71   : > { %4034 = vrsqrt.f32 %v2741_v41 }
 0xa73   : > { %v4029_v5 = vpop.eup %4028 }
 0xa74   : > { %v2754_v10 = vmul.f32 %v4029_v5, %v5326_v24 }
 0xa75   : > { %v4031_v18 = vpop.eup %4030 }
 0xa76   : > { %v2755_v13 = vmul.f32 %v4031_v18, %v5328_v28  ;;  %v2766_v21 = vmul.f32 %v2765_v17, %v2754_v10 }
 0xa77   : > { %v4033_v25 = vpop.eup %4032 }
 0xa78   : > { %v2756_v27 = vmul.f32 %v4033_v25, %v5332_v31  ;;  %v2767_v29 = vmul.f32 %v2765_v17, %v2755_v13  ;;  %v5379_v20 = vadd.f32 %v2777_v16, %v2766_v21 }
 0xa7a   : > { %v5381_v33 = vadd.f32 %v2777_v16, %v2767_v29  ;;  %v2768_v34 = vmul.f32 %v2765_v17, %v2756_v27 }
 0xa7b   : > { %v4035_v14 = vpop.eup %4034 }
 0xa7c   : > { %v2757_v37 = vmul.f32 %v4035_v14, %v5340_v42  ;;  %v2786_v24 = vpack.c.bf16 %v5381_v33, %v5379_v20  ;;  %v5387_v28 = vadd.f32 %v2777_v16, %v2768_v34 }
 0xa7e   : > { %v2769_v30 = vmul.f32 %v2765_v17, %v2757_v37  ;;  %3789 = vmatprep.mubr.msk.bf16.mxu1 %vm628_vm1, %v2786_v24 }
 0xa80   : > { %v5389_v39 = vadd.f32 %v2777_v16, %v2769_v30 }
 0xa82   : > { %v2787_v31 = vpack.c.bf16 %v5389_v39, %v5387_v28 }
 0xa84   : > { %3790 = vmatmul.mubr.msk.bf16.vlgmr.msra.gmra.mrb[72].mxu1 %vm628_vm1, %v2787_v31 }
 0xaa1   : > { %v2720_v19 = vpop.xlane.xlu1 %2719 }
 0xaa2   : > { %v2734_v44 = vmul.f32 0.03125, %v2720_v19 }
 0xaa3   : > { %v2723_v43 = vpop.xlane.xlu0 %2722 }
 0xaa4   : > { %v2742_v35 = vadd.f32 1e-05, %v2734_v44  ;;  %v2735_v42 = vmul.f32 0.03125, %v2723_v43 }
 0xaa5   : > { %v2726_v26 = vpop.xlane.xlu1 %2725 }
 0xaa6   : > { %4036 = vrsqrt.f32 %v2742_v35  ;;  %v2743_v49 = vadd.f32 1e-05, %v2735_v42  ;;  %v2736_v45 = vmul.f32 0.03125, %v2726_v26  ;;  %v2912_v35 = vsub.s32 3, %v4940_v1 }
 0xaa7   : > { %v2729_v48 = vpop.xlane.xlu0 %2728 }
 0xaa8   : > { %4038 = vrsqrt.f32 %v2743_v49  ;;  %v2744_v52 = vadd.f32 1e-05, %v2736_v45  ;;  %v2737_v53 = vmul.f32 0.03125, %v2729_v48  ;;  %v2913_v42 = vrot.slane %v5315_v23, %v2912_v35 }
 0xaaa   : > { %4040 = vrsqrt.f32 %v2744_v52  ;;  %v2745_v54 = vadd.f32 1e-05, %v2737_v53 }
 0xaac   : > { %4042 = vrsqrt.f32 %v2745_v54 }
 0xab0   : > { %v4037_v51 = vpop.eup %4036 }
 0xab1   : > { %v2758_v55 = vmul.f32 %v4037_v51, %v5350_v50 }
 0xab2   : > { %v4039_v57 = vpop.eup %4038 }
 0xab3   : > { %v2759_v59 = vmul.f32 %v4039_v57, %v5352_v22  ;;  %v2770_v60 = vmul.f32 %v2765_v17, %v2758_v55 }
 0xab4   : > { %v4041_v62 = vpop.eup %4040 }
 0xab5   : > { %v2760_v63 = vmul.f32 %v4041_v62, %v5356_v38  ;;  %v2771_v58 = vmul.f32 %v2765_v17, %v2759_v59  ;;  %v5398_v0 = vadd.f32 %v2777_v16, %v2770_v60 }
 0xab6   : > { %v4043_v46 = vpop.eup %4042 }
 0xab7   : > { %v2761_v47 = vmul.f32 %v4043_v46, %v5361_v61  ;;  %v5400_v2 = vadd.f32 %v2777_v16, %v2771_v58  ;;  %v2772_v3 = vmul.f32 %v2765_v17, %v2760_v63  ;;  %v3962_v61 = vld [vmem:[%s4842_s24 + $0x10] sm:$0xff]  }
 0xab8   : > { %3801 = vmatprep.subr.bf16.mxu0 %v3962_v61 }
 0xab9   : > { %v2788_v50 = vpack.c.bf16 %v5400_v2, %v5398_v0  ;;  %v2773_v22 = vmul.f32 %v2765_v17, %v2761_v47  ;;  %v5405_v6 = vadd.f32 %v2777_v16, %v2772_v3  ;;  %3802 = vmatpush3.bf16.msra.mxu0 %v3962_v61 }
 0xaba   : > { %3803 = vmatprep.subr.bf16.mxu0 %v3963_v4 }
 0xabb   : > { %3793 = vmatprep.mubr.msk.bf16.mxu1 %vm628_vm1, %v2788_v50  ;;  %v5407_v38 = vadd.f32 %v2777_v16, %v2773_v22 }
 0xabd   : > { %v2789_v36 = vpack.c.bf16 %v5407_v38, %v5405_v6  ;;  %3804 = vmatpush3.bf16.msra.mxu0 %v3963_v4 }
 0xabf   : > { %3794 = vmatmul.mubr.msk.bf16.gmra.mrb[76].mxu1 %vm628_vm1, %v2789_v36 }
 0xb57   : > { %v3791_v8 = vpop.f32.mrb[72].mxu1 }
 0xb58   : > { %v2868_v9 = vadd.f32 %v3791_v8, %v3455_v7  ;;  %v2859_v11 = vpop.f32.mrb[73].mxu1 }
 0xb59   : > { %v2860_v12 = vadd.f32 %v3455_v7, %v2859_v11  ;;  %v3792_v32 = vpop.f32.mrb[74].mxu1 }
 0xb5a   : > { %v2871_v40 = vadd.f32 %v3792_v32, %v3455_v7  ;;  %v2862_v15 = vpop.f32.mrb[75].mxu1  ;;  %v2892_v17 = vmax.f32 %v2868_v9, 0.0 }
 0xb5b   : > { %v2863_v41 = vadd.f32 %v3455_v7, %v2862_v15  ;;  %v2890_v5 = vmax.f32 %v2860_v12, 0.0 }
 0xb5c   : > { %v2893_v56 = vmax.f32 %v2871_v40, 0.0 }
 0xb5d   : > { %v2891_v10 = vmax.f32 %v2863_v41, 0.0 }
 0xb5e   : > { %v2899_v18 = vpack.c.bf16 %v2893_v56, %v2892_v17 }
 0xb5f   : > { %v2898_v13 = vpack.c.bf16 %v2891_v10, %v2890_v5 }
 0xb61   : > { %3805 = vmatprep.mubr.msk.bf16.mxu0 %vm2938_vm7, %v2898_v13 }
 0xb62   : > { %3806 = vmatmul.mubr.msk.bf16.vlgmr.msra.gmra.mrb[72].mxu0 %vm2938_vm7, %v2899_v18 }
 0xb92   : > { %v3795_v21 = vpop.f32.mrb[76].mxu1 }
 0xb93   : > { %v2884_v16 = vadd.f32 %v3795_v21, %v3455_v7  ;;  %v2875_v25 = vpop.f32.mrb[77].mxu1 }
 0xb94   : > { %v2876_v27 = vadd.f32 %v3455_v7, %v2875_v25  ;;  %v3796_v29 = vpop.f32.mrb[78].mxu1 }
 0xb95   : > { %v2887_v14 = vadd.f32 %v3796_v29, %v3455_v7  ;;  %v2878_v34 = vpop.f32.mrb[79].mxu1  ;;  %v2896_v24 = vmax.f32 %v2884_v16, 0.0 }
 0xb96   : > { %v2879_v37 = vadd.f32 %v3455_v7, %v2878_v34  ;;  %v2894_v31 = vmax.f32 %v2876_v27, 0.0 }
 0xb97   : > { %v2897_v30 = vmax.f32 %v2887_v14, 0.0 }
 0xb98   : > { %v2895_v19 = vmax.f32 %v2879_v37, 0.0 }
 0xb99   : > { %v2901_v44 = vpack.c.bf16 %v2897_v30, %v2896_v24 }
 0xb9a   : > { %v2900_v43 = vpack.c.bf16 %v2895_v19, %v2894_v31 }
 0xb9c   : > { %3809 = vmatprep.mubr.msk.bf16.mxu0 %vm2938_vm7, %v2900_v43 }
 0xb9d   : > { %3810 = vmatmul.mubr.msk.bf16.gmra.mrb[76].mxu0 %vm2938_vm7, %v2901_v44 }
 0xc35   : > { %v3807_v26 = vpop.f32.mrb[72].mxu0 }
 0xc36   : > { %v2994_v49 = vadd.f32 %v3807_v26, %v2913_v42  ;;  %v2985_v45 = vpop.f32.mrb[73].mxu0 }
 0xc37   : > { %v2986_v48 = vadd.f32 %v2985_v45, %v2913_v42  ;;  %v3808_v52 = vpop.f32.mrb[74].mxu0 }
 0xc38   : > { %v2997_v53 = vadd.f32 %v3808_v52, %v2913_v42  ;;  %v2988_v54 = vpop.f32.mrb[75].mxu0  ;;  %v3018_v51 = vadd.f32 %v2994_v49, %v5387_v28 }
 0xc39   : > { %v2989_v55 = vadd.f32 %v2988_v54, %v2913_v42  ;;  %v3016_v60 = vadd.f32 %v2986_v48, %v5379_v20 }
 0xc3a   : > { %v3030_v57 = vsel %vm628_vm1, %v3018_v51, 0.0  ;;  %v3019_v59 = vadd.f32 %v2997_v53, %v5389_v39 }
 0xc3b   : > { %3031 = vadd.xlane.f32.xlu1 %v3030_v57  ;;  %v3017_v63 = vadd.f32 %v2989_v55, %v5381_v33  ;;  %v3024_v58 = vsel %vm628_vm1, %v3016_v60, 0.0 }
 0xc3c   : > { %v3033_v62 = vsel %vm628_vm1, %v3019_v59, 0.0 }
 0xc3d   : > { %3034 = vadd.xlane.f32.xlu0 %v3033_v62  ;;  %v3027_v46 = vsel %vm628_vm1, %v3017_v63, 0.0 }
 0xc3f   : > { %3025 = vadd.xlane.f32.xlu1 %v3024_v58 }
 0xc41   : > { %3028 = vadd.xlane.f32.xlu0 %v3027_v46 }
 0xc70   : > { %v3811_v28 = vpop.f32.mrb[76].mxu0 }
 0xc71   : > { %v3010_v47 = vadd.f32 %v3811_v28, %v2913_v42  ;;  %v3001_v3 = vpop.f32.mrb[77].mxu0 }
 0xc72   : > { %v3002_v50 = vadd.f32 %v3001_v3, %v2913_v42  ;;  %v3812_v22 = vpop.f32.mrb[78].mxu0 }
 0xc73   : > { %v3013_v39 = vadd.f32 %v3812_v22, %v2913_v42  ;;  %v3004_v36 = vpop.f32.mrb[79].mxu0  ;;  %v3022_v7 = vadd.f32 %v3010_v47, %v5405_v6 }
 0xc74   : > { %v3005_v20 = vadd.f32 %v3004_v36, %v2913_v42  ;;  %v3020_v61 = vadd.f32 %v3002_v50, %v5398_v0  ;;  %v3130_v36 = vsub.s32 4, %v4940_v1 }
 0xc75   : > { %v3023_v8 = vadd.f32 %v3013_v39, %v5407_v38  ;;  %v3042_v11 = vsel %vm628_vm1, %v3022_v7, 0.0 }
 0xc76   : > { %v3021_v4 = vadd.f32 %v3005_v20, %v5400_v2  ;;  %v3036_v33 = vsel %vm628_vm1, %v3020_v61, 0.0  ;;  %v3142_v20 = vsub.s32 5, %v4940_v1 }
 0xc77   : > { %3037 = vadd.xlane.f32.xlu1 %v3036_v33  ;;  %v3045_v12 = vsel %vm628_vm1, %v3023_v8, 0.0 }
 0xc78   : > { %v3039_v9 = vsel %vm628_vm1, %v3021_v4, 0.0  ;;  %v3143_v33 = vrot.slane %v5315_v23, %v3142_v20 }
 0xc79   : > { %3040 = vadd.xlane.f32.xlu0 %v3039_v9 }
 0xc7b   : > { %3043 = vadd.xlane.f32.xlu1 %v3042_v11 }
 0xc7d   : > { %3046 = vadd.xlane.f32.xlu0 %v3045_v12 }
 0xcc8   : > { %v3032_v32 = vpop.xlane.xlu1 %3031 }
 0xcc9   : > { %v3050_v0 = vmul.f32 0.03125, %v3032_v32 }
 0xcca   : > { %v3035_v40 = vpop.xlane.xlu0 %3034 }
 0xccb   : > { %v5438_v2 = vsub.f32 %v3018_v51, %v3050_v0  ;;  %v3051_v15 = vmul.f32 0.03125, %v3035_v40 }
 0xccc   : > { %v3026_v41 = vpop.xlane.xlu1 %3025 }
 0xccd   : > { %v5440_v6 = vsub.f32 %v3019_v59, %v3051_v15  ;;  %v3048_v17 = vmul.f32 0.03125, %v3026_v41  ;;  %v3066_v38 = vmul.f32 %v5438_v2, %v5438_v2 }
 0xcce   : > { %v3029_v56 = vpop.xlane.xlu0 %3028 }
 0xccf   : > { %v5444_v5 = vsub.f32 %v3016_v60, %v3048_v17  ;;  %v3049_v10 = vmul.f32 0.03125, %v3029_v56  ;;  %v3078_v18 = vsel %vm628_vm1, %v3066_v38, 0.0  ;;  %v3067_v13 = vmul.f32 %v5440_v6, %v5440_v6 }
 0xcd0   : > { %3079 = vadd.xlane.f32.xlu1 %v3078_v18 }
 0xcd1   : > { %v5449_v21 = vsub.f32 %v3017_v63, %v3049_v10  ;;  %v3081_v16 = vsel %vm628_vm1, %v3067_v13, 0.0  ;;  %v3064_v25 = vmul.f32 %v5444_v5, %v5444_v5 }
 0xcd2   : > { %3082 = vadd.xlane.f32.xlu0 %v3081_v16 }
 0xcd3   : > { %v3072_v27 = vsel %vm628_vm1, %v3064_v25, 0.0  ;;  %v3065_v29 = vmul.f32 %v5449_v21, %v5449_v21 }
 0xcd4   : > { %3073 = vadd.xlane.f32.xlu1 %v3072_v27 }
 0xcd5   : > { %v3075_v14 = vsel %vm628_vm1, %v3065_v29, 0.0 }
 0xcd6   : > { %3076 = vadd.xlane.f32.xlu0 %v3075_v14 }
 0xd04   : > { %v3038_v34 = vpop.xlane.xlu1 %3037 }
 0xd05   : > { %v3052_v37 = vmul.f32 0.03125, %v3038_v34 }
 0xd06   : > { %v3041_v24 = vpop.xlane.xlu0 %3040 }
 0xd07   : > { %v5458_v30 = vsub.f32 %v3020_v61, %v3052_v37  ;;  %v3053_v31 = vmul.f32 0.03125, %v3041_v24  ;;  %v3131_v61 = vrot.slane %v5315_v23, %v3130_v36 }
 0xd08   : > { %v3044_v19 = vpop.xlane.xlu1 %3043 }
 0xd09   : > { %v5460_v44 = vsub.f32 %v3021_v4, %v3053_v31  ;;  %v3054_v43 = vmul.f32 0.03125, %v3044_v19  ;;  %v3068_v35 = vmul.f32 %v5458_v30, %v5458_v30 }
 0xd0a   : > { %v3047_v42 = vpop.xlane.xlu0 %3046 }
 0xd0b   : > { %v5464_v26 = vsub.f32 %v3022_v7, %v3054_v43  ;;  %v3055_v49 = vmul.f32 0.03125, %v3047_v42  ;;  %v3084_v45 = vsel %vm628_vm1, %v3068_v35, 0.0  ;;  %v3069_v48 = vmul.f32 %v5460_v44, %v5460_v44 }
 0xd0c   : > { %3085 = vadd.xlane.f32.xlu1 %v3084_v45 }
 0xd0d   : > { %v5469_v52 = vsub.f32 %v3023_v8, %v3055_v49  ;;  %v3087_v53 = vsel %vm628_vm1, %v3069_v48, 0.0  ;;  %v3070_v54 = vmul.f32 %v5464_v26, %v5464_v26 }
 0xd0e   : > { %3088 = vadd.xlane.f32.xlu0 %v3087_v53 }
 0xd0f   : > { %v3090_v51 = vsel %vm628_vm1, %v3070_v54, 0.0  ;;  %v3071_v55 = vmul.f32 %v5469_v52, %v5469_v52 }
 0xd10   : > { %3091 = vadd.xlane.f32.xlu1 %v3090_v51 }
 0xd11   : > { %v3093_v57 = vsel %vm628_vm1, %v3071_v55, 0.0 }
 0xd12   : > { %3094 = vadd.xlane.f32.xlu0 %v3093_v57 }
 0xd5d   : > { %v3080_v59 = vpop.xlane.xlu1 %3079 }
 0xd5e   : > { %v3098_v60 = vmul.f32 0.03125, %v3080_v59 }
 0xd5f   : > { %v3083_v62 = vpop.xlane.xlu0 %3082 }
 0xd60   : > { %v3106_v63 = vadd.f32 1e-05, %v3098_v60  ;;  %v3099_v58 = vmul.f32 0.03125, %v3083_v62 }
 0xd61   : > { %v3074_v46 = vpop.xlane.xlu1 %3073 }
 0xd62   : > { %4044 = vrsqrt.f32 %v3106_v63  ;;  %v3107_v28 = vadd.f32 1e-05, %v3099_v58  ;;  %v3096_v47 = vmul.f32 0.03125, %v3074_v46 }
 0xd63   : > { %v3077_v3 = vpop.xlane.xlu0 %3076 }
 0xd64   : > { %4046 = vrsqrt.f32 %v3107_v28  ;;  %v3104_v50 = vadd.f32 1e-05, %v3096_v47  ;;  %v3097_v22 = vmul.f32 0.03125, %v3077_v3 }
 0xd66   : > { %4048 = vrsqrt.f32 %v3104_v50  ;;  %v3105_v39 = vadd.f32 1e-05, %v3097_v22 }
 0xd68   : > { %4050 = vrsqrt.f32 %v3105_v39 }
 0xd6c   : > { %v4045_v4 = vpop.eup %4044 }
 0xd6d   : > { %v3122_v7 = vmul.f32 %v4045_v4, %v5438_v2 }
 0xd6e   : > { %v4047_v8 = vpop.eup %4046 }
 0xd6f   : > { %v3134_v9 = vmul.f32 %v3131_v61, %v3122_v7  ;;  %v3123_v11 = vmul.f32 %v4047_v8, %v5440_v6 }
 0xd70   : > { %v4049_v12 = vpop.eup %4048 }
 0xd71   : > { %v3146_v32 = vadd.f32 %v3143_v33, %v3134_v9  ;;  %v3135_v0 = vmul.f32 %v3131_v61, %v3123_v11  ;;  %v3120_v40 = vmul.f32 %v4049_v12, %v5444_v5 }
 0xd72   : > { %v4051_v15 = vpop.eup %4050 }
 0xd73   : > { %3154 = vst.msk [vmem:[#allocation2 + $0x10] sm:$0xff] %vm628_vm1, %v3146_v32  ;;  %v3147_v1 = vadd.f32 %v3143_v33, %v3135_v0  ;;  %v3132_v41 = vmul.f32 %v3131_v61, %v3120_v40  ;;  %v3121_v17 = vmul.f32 %v4051_v15, %v5449_v21  ;;  %3166 = vst.msk [vmem:[#allocation17 + $0x10] sm:$0xff] (!%p3470_p6), %vm628_vm1, %v3146_v32 }
 0xd75   : > { %3155 = vst.msk [vmem:[#allocation2 + $0x18] sm:$0xff] %vm628_vm1, %v3147_v1  ;;  %v3144_v23 = vadd.f32 %v3143_v33, %v3132_v41  ;;  %v3133_v2 = vmul.f32 %v3131_v61, %v3121_v17  ;;  %3167 = vst.msk [vmem:[#allocation17 + $0x18] sm:$0xff] (!%p3470_p6), %vm628_vm1, %v3147_v1 }
 0xd77   : > { %3152 = vst.msk [vmem:[#allocation2] sm:$0xff] %vm628_vm1, %v3144_v23  ;;  %v3145_v38 = vadd.f32 %v3143_v33, %v3133_v2  ;;  %3164 = vst.msk [vmem:[#allocation17] sm:$0xff] (!%p3470_p6), %vm628_vm1, %v3144_v23 }
 0xd79   : > { %3153 = vst.msk [vmem:[#allocation2 + $0x8] sm:$0xff] %vm628_vm1, %v3145_v38  ;;  %3165 = vst.msk [vmem:[#allocation17 + $0x8] sm:$0xff] (!%p3470_p6), %vm628_vm1, %v3145_v38 }
 0xd99   : > { %v3086_v6 = vpop.xlane.xlu1 %3085 }
 0xd9a   : > { %v3100_v56 = vmul.f32 0.03125, %v3086_v6 }
 0xd9b   : > { %v3089_v10 = vpop.xlane.xlu0 %3088 }
 0xd9c   : > { %v3108_v5 = vadd.f32 1e-05, %v3100_v56  ;;  %v3101_v18 = vmul.f32 0.03125, %v3089_v10 }
 0xd9d   : > { %v3092_v13 = vpop.xlane.xlu1 %3091 }
 0xd9e   : > { %4052 = vrsqrt.f32 %v3108_v5  ;;  %v3109_v16 = vadd.f32 1e-05, %v3101_v18  ;;  %v3102_v25 = vmul.f32 0.03125, %v3092_v13 }
 0xd9f   : > { %v3095_v27 = vpop.xlane.xlu0 %3094 }
 0xda0   : > { %4054 = vrsqrt.f32 %v3109_v16  ;;  %v3110_v21 = vadd.f32 1e-05, %v3102_v25  ;;  %v3103_v29 = vmul.f32 0.03125, %v3095_v27 }
 0xda2   : > { %4056 = vrsqrt.f32 %v3110_v21  ;;  %v3111_v14 = vadd.f32 1e-05, %v3103_v29 }
 0xda4   : > { %4058 = vrsqrt.f32 %v3111_v14 }
 0xda8   : > { %v4053_v34 = vpop.eup %4052 }
 0xda9   : > { %v3124_v37 = vmul.f32 %v4053_v34, %v5458_v30 }
 0xdaa   : > { %v4055_v24 = vpop.eup %4054 }
 0xdab   : > { %v3136_v31 = vmul.f32 %v3131_v61, %v3124_v37  ;;  %v3125_v19 = vmul.f32 %v4055_v24, %v5460_v44 }
 0xdac   : > { %v4057_v43 = vpop.eup %4056 }
 0xdad   : > { %v3148_v35 = vadd.f32 %v3143_v33, %v3136_v31  ;;  %v3137_v42 = vmul.f32 %v3131_v61, %v3125_v19  ;;  %v3126_v49 = vmul.f32 %v4057_v43, %v5464_v26 }
 0xdae   : > { %v4059_v45 = vpop.eup %4058 }
 0xdaf   : > { %3156 = vst.msk [vmem:[#allocation2 + $0x20] sm:$0xff] %vm628_vm1, %v3148_v35  ;;  %v3149_v48 = vadd.f32 %v3143_v33, %v3137_v42  ;;  %v3138_v53 = vmul.f32 %v3131_v61, %v3126_v49  ;;  %v3127_v54 = vmul.f32 %v4059_v45, %v5469_v52  ;;  %3163 = sbr.rel (%p3470_p6) target bundleno = 3510 (0xdb6), region = 92  ;;  %3168 = vst.msk [vmem:[#allocation17 + $0x20] sm:$0xff] (!%p3470_p6), %vm628_vm1, %v3148_v35 }
 0xdb1   : > { %3157 = vst.msk [vmem:[#allocation2 + $0x28] sm:$0xff] %vm628_vm1, %v3149_v48  ;;  %v3150_v51 = vadd.f32 %v3143_v33, %v3138_v53  ;;  %v3139_v30 = vmul.f32 %v3131_v61, %v3127_v54  ;;  %3169 = vst.msk [vmem:[#allocation17 + $0x28] sm:$0xff] (!%p3470_p6), %vm628_vm1, %v3149_v48 }
 0xdb3   : > { %3158 = vst.msk [vmem:[#allocation2 + $0x30] sm:$0xff] %vm628_vm1, %v3150_v51  ;;  %v3151_v55 = vadd.f32 %v3143_v33, %v3139_v30  ;;  %3170 = vst.msk [vmem:[#allocation17 + $0x30] sm:$0xff] (!%p3470_p6), %vm628_vm1, %v3150_v51 }
 0xdb5   : > { %3159 = vst.msk [vmem:[#allocation2 + $0x38] sm:$0xff] %vm628_vm1, %v3151_v55  ;;  %3171 = vst.msk [vmem:[#allocation17 + $0x38] sm:$0xff] (!%p3470_p6), %vm628_vm1, %v3151_v55 }
 0xdb6 PF: > { %p3868_p10 = scmp.eq.s32.totalorder %s4646_s21, 1  ;;  %s4424_s1 = smov [#allocation17]  }
 0xdb7   : > { %s3181_s19 = sshll.u32 %s4424_s1, 4  ;;  %s3182_s19 = int_to_ptr.vmem [resolvable:$true] %s3181_s19 }
 0xdb8   : > { %s4306_s22 = scalar_lea.vmem %s3182_s19, 1024  ;;  %p4313_p9 = scmp.lt.s32.totalorder %s3182_s19, %s3182_s19 }
 0xdb9   : > { %p4307_p1 = scmp.ne.s32.totalorder %s3182_s19, %s4306_s22  ;;  %p4314_p2 = scmp.lt.s32.totalorder %s4306_s22, %s4306_s22 }
 0xdbb   : > { %p4308_p11 = pnand %p4307_p1, %p3868_p10  ;;  %p4315_p7 = por %p4314_p2, %p4313_p9 }
 0xdbd   : > { %p4309_p13 = pneg %p4308_p11 }
 0xdbf   : > { %p4316_p8 = pnand %p4315_p7, %p4309_p13 }
 0xdc1   : > { %4319 = shalt.err (!%p4316_p8)
}
 0xdc2   : > { %s5610_s27 = sld [smem:[#allocation32_spill]] }
 0xdc8   : > { %s5611_s8 = smov %s5610_s27  ;;  %s4320_s17 = scalar_lea.hbm %s5610_s27, 1024 }
 0xdc9   : > { %p4321_p3 = scmp.ne.s32.totalorder %s5611_s8, %s4320_s17  ;;  %p4326_p12 = scmp.lt.u32.totalorder %s4320_s17, %s5611_s8 }
 0xdcb   : > { %p4322_p4 = pnand %p4321_p3, %p3868_p10 }
 0xdcd   : > { %p4323_p0 = pneg %p4322_p4 }
 0xdcf   : > { %p4328_p5 = pnand %p4326_p12, %p4323_p0 }
 0xdd1   : > { %4331 = shalt.err (!%p4328_p5)
}
 0xdd2   : > { %s4425_s24 = smov 128   ;;  %s4426_s5 = smov 8  }
 0xdd3   : > { %3836 = dma.vmem_to_hbm [thread:$0]  (%p3868_p10), %s3182_s19, 1024, %s5611_s8, [#allocation5], %s4425_s24, %s4425_s24, %s4426_s5  }
 0xdd4   : > { %4377 = dma.done.wait (%p3868_p10), [#allocation5], 1024  }
 0xdd5   : > { %4379 = vsyncadd (%p3868_p10), [#allocation5], 4294966272 }
 0xdd6 PF: > { %s5612_s20 = sld [smem:[#allocation26_spill]]  ;;  %s5613_s23 = sld [smem:[#allocation24_spill]] }
 0xdd7   : > { %s5614_s29 = sld [smem:[#allocation28_spill]]  ;;  %s5615_s15 = sld [smem:[#allocation27_spill]] }
 0xdd8   : > { %s5616_s27 = smov %s4386_s28  ;;  %s5618_s30 = smov %s4398_s9 }
 0xddc   : > { %s32_s10 = sadd.s32 1, %s5612_s20   ;;  %s5617_s28 = smov %s5613_s23 }
 0xddd   : > { %p29_p6 = scmp.ge.s32.totalorder %s32_s10, 4   ;;  %s5619_s9 = smov %s5615_s15 }
 0xddf   :  { %31 = sbr.rel (!%p29_p6) target bundleno = 17 (0x11), region = 176 }
 0xde6   :  { %3197 = vsyncpa [#allocation4], 1 }
 0xde7   :  { %3199 = vsyncpa [#allocation4 + $0x1], 1 }
 0xde8   :  { %3200 = vsyncpa [#allocation7], 1 }
 0xde9   :  { %3202 = vsyncpa [#allocation7 + $0x1], 1 }
 0xdea   :  { %3203 = vsyncpa [#allocation10], 1 }
 0xdeb   :  { %3205 = vsyncpa [#allocation10 + $0x1], 1 }
 0xdec   :  { %3206 = vsyncpa [#allocation13], 1 }
 0xded   :  { %3208 = vsyncpa [#allocation13 + $0x1], 1 }
 0xdee   :  { %3209 = vsyncpa [#allocation16], 1 }
 0xdef   :  { %3211 = vsyncpa [#allocation16 + $0x1], 1 }
 0xdf0   :  { %3212 = vsyncpa [#allocation5], 1 }
 0xdf1   :  { %3214 = vsyncpa [#allocation5 + $0x1], 1 }

</bundles_post_ra>
